<compile_context>
chip_gen: v6e
topology: v6e:2x2x1
jax: 0.10.0
libtpu: 0.0.40
codegen_flags: <defaults>
</compile_context>

<pallas_src>
import functools

import jax
import jax.numpy as jnp
from jax.experimental import pallas as pl
from jax.experimental.pallas import tpu as pltpu

_VMEM_LIMIT_BYTES = 48 * 1024 * 1024          # explicit scoped-VMEM ceiling (safe on v5e/v6e/v7x)
_MM_SEMANTICS = ("parallel", "parallel", "arbitrary")


def _round_up(x, m):
    return ((x + m - 1) // m) * m


def _pick_row_tile(n_rows, dim, in_itemsize, out_itemsize,
                   budget_bytes=24 * 1024 * 1024, cap=1024):
    """Largest row tile (multiple of 8) whose double-buffered in+out footprint fits the budget."""
    per_row = 2 * dim * (in_itemsize + out_itemsize)
    t = budget_bytes // max(per_row, 1)
    t = max(8, min(cap, t))
    t = (t // 8) * 8
    t = min(t, _round_up(n_rows, 8))
    return max(8, t)


def _pick_tile(total, cap, quantum=128):
    """Largest multiple of `quantum` <= cap that evenly divides `total` (falls back to full extent)."""
    if total % quantum != 0:
        return total
    best = quantum
    t = quantum
    limit = min(cap, total)
    while t <= limit:
        if total % t == 0:
            best = t
        t += quantum
    return best


def _matmul_grid(rows, k_dim, n_dim, tm_cap=256, tn_cap=256, tk_cap=512):
    tm = min(tm_cap, _round_up(rows, 8))
    tn = _pick_tile(n_dim, tn_cap)
    tk = _pick_tile(k_dim, tk_cap)
    grid = (pl.cdiv(rows, tm), n_dim // tn, k_dim // tk)
    return tm, tn, tk, grid


def _silu(v):
    return v * jax.nn.sigmoid(v)


# ---------------------------------------------------------------------------
# RMSNorm kernel
# ---------------------------------------------------------------------------
def _rmsnorm_kernel(x_ref, w_ref, o_ref, *, eps, inv_dim):
    x32 = x_ref[...].astype(jnp.float32)
    ms = jnp.sum(x32 * x32, axis=-1, keepdims=True) * inv_dim        # mean(x^2) as sum * (1/dim)
    y = (x32 * jax.lax.rsqrt(ms + eps)).astype(x_ref.dtype)          # x * rsqrt(mean + eps), .type_as(x)
    o_ref[...] = (y * w_ref[...]).astype(o_ref.dtype)


def rmsnorm(x, weight, eps=1e-6):
    orig_shape = x.shape
    dim = orig_shape[-1]
    x2d = x.reshape(-1, dim)
    rows = x2d.shape[0]
    out_dtype = jnp.result_type(x.dtype, weight.dtype)
    tile_rows = _pick_row_tile(rows, dim, x2d.dtype.itemsize, jnp.dtype(out_dtype).itemsize)
    grid = (pl.cdiv(rows, tile_rows),)        # ragged last block handled by Pallas (no pad/copy)
    kernel = functools.partial(_rmsnorm_kernel, eps=float(eps), inv_dim=1.0 / dim)
    out = pl.pallas_call(
        kernel,
        out_shape=jax.ShapeDtypeStruct((rows, dim), out_dtype),
        grid_spec=pltpu.PrefetchScalarGridSpec(
            num_scalar_prefetch=0,
            grid=grid,
            in_specs=[pl.BlockSpec((tile_rows, dim), lambda i: (i, 0)),
                      pl.BlockSpec((1, dim), lambda i: (0, 0))],
            out_specs=pl.BlockSpec((tile_rows, dim), lambda i: (i, 0)),
        ),
        compiler_params=pltpu.CompilerParams(
            dimension_semantics=("parallel",),
            vmem_limit_bytes=_VMEM_LIMIT_BYTES),
        cost_estimate=pl.CostEstimate(
            flops=int(3 * rows * dim),
            transcendentals=int(rows),
            bytes_accessed=int(rows * dim * (x2d.dtype.itemsize + jnp.dtype(out_dtype).itemsize)
                               + dim * weight.dtype.itemsize)),
    )(x2d, weight.reshape(1, dim))
    return out.reshape(*orig_shape[:-1], dim)


# ---------------------------------------------------------------------------
# Fused matmul kernels (gated linear / gated linear + residual / linear + residual)
# ---------------------------------------------------------------------------
def _gated_linear_kernel(x_ref, wa_ref, ba_ref, wb_ref, bb_ref, o_ref, acc_a, acc_b):
    k = pl.program_id(2)

    @pl.when(k == 0)
    def _():
        acc_a[...] = jnp.zeros_like(acc_a)
        acc_b[...] = jnp.zeros_like(acc_b)

    x = x_ref[...]                                   # read once, feed both matmuls
    acc_a[...] += jnp.dot(x, wa_ref[...], preferred_element_type=jnp.float32)
    acc_b[...] += jnp.dot(x, wb_ref[...], preferred_element_type=jnp.float32)

    @pl.when(k == pl.num_programs(2) - 1)
    def _():
        va = acc_a[...] + ba_ref[...].astype(jnp.float32)
        vb = acc_b[...] + bb_ref[...].astype(jnp.float32)
        o_ref[...] = (va * _silu(vb)).astype(o_ref.dtype)


def _gated_linear2_res_kernel(a_ref, b_ref, wa_ref, ba_ref, wb_ref, bb_ref, r_ref,
                              o_ref, acc_a, acc_b):
    k = pl.program_id(2)

    @pl.when(k == 0)
    def _():
        acc_a[...] = jnp.zeros_like(acc_a)
        acc_b[...] = jnp.zeros_like(acc_b)

    acc_a[...] += jnp.dot(a_ref[...], wa_ref[...], preferred_element_type=jnp.float32)
    acc_b[...] += jnp.dot(b_ref[...], wb_ref[...], preferred_element_type=jnp.float32)

    @pl.when(k == pl.num_programs(2) - 1)
    def _():
        va = acc_a[...] + ba_ref[...].astype(jnp.float32)
        vb = acc_b[...] + bb_ref[...].astype(jnp.float32)
        o_ref[...] = (va * _silu(vb) + r_ref[...].astype(jnp.float32)).astype(o_ref.dtype)


def _linear_res_kernel(x_ref, w_ref, b_ref, r_ref, o_ref, acc):
    k = pl.program_id(2)

    @pl.when(k == 0)
    def _():
        acc[...] = jnp.zeros_like(acc)

    acc[...] += jnp.dot(x_ref[...], w_ref[...], preferred_element_type=jnp.float32)

    @pl.when(k == pl.num_programs(2) - 1)
    def _():
        o_ref[...] = (acc[...] + b_ref[...].astype(jnp.float32)
                      + r_ref[...].astype(jnp.float32)).astype(o_ref.dtype)


def gated_linear(x, wa, ba, wb, bb):
    """(x @ wa + ba) * SiLU(x @ wb + bb); weights are stored (in, out)."""
    orig_shape = x.shape
    kd = orig_shape[-1]
    nd = wa.shape[1]
    x2d = x.reshape(-1, kd)
    rows = x2d.shape[0]
    tm, tn, tk, grid = _matmul_grid(rows, kd, nd)
    out = pl.pallas_call(
        _gated_linear_kernel,
        out_shape=jax.ShapeDtypeStruct((rows, nd), x.dtype),
        grid_spec=pltpu.PrefetchScalarGridSpec(
            num_scalar_prefetch=0,
            grid=grid,
            in_specs=[
                pl.BlockSpec((tm, tk), lambda i, j, k: (i, k)),
                pl.BlockSpec((tk, tn), lambda i, j, k: (k, j)),
                pl.BlockSpec((1, tn), lambda i, j, k: (0, j)),
                pl.BlockSpec((tk, tn), lambda i, j, k: (k, j)),
                pl.BlockSpec((1, tn), lambda i, j, k: (0, j)),
            ],
            out_specs=pl.BlockSpec((tm, tn), lambda i, j, k: (i, j)),
            scratch_shapes=[pltpu.VMEM((tm, tn), jnp.float32),
                            pltpu.VMEM((tm, tn), jnp.float32)],
        ),
        compiler_params=pltpu.CompilerParams(
            dimension_semantics=_MM_SEMANTICS,
            vmem_limit_bytes=_VMEM_LIMIT_BYTES),
        cost_estimate=pl.CostEstimate(
            flops=int(4 * rows * kd * nd),
            transcendentals=int(rows * nd),
            bytes_accessed=int(4 * (rows * kd + 2 * kd * nd + rows * nd + 2 * nd))),
    )(x2d, wa, ba.reshape(1, nd), wb, bb.reshape(1, nd))
    return out.reshape(*orig_shape[:-1], nd)


def gated_linear2_residual(a, b, wa, ba, wb, bb, residual):
    """(a @ wa + ba) * SiLU(b @ wb + bb) + residual, all fused in one kernel."""
    orig_shape = a.shape
    kd = orig_shape[-1]
    nd = wa.shape[1]
    a2d = a.reshape(-1, kd)
    b2d = b.reshape(-1, kd)
    r2d = residual.reshape(-1, nd)
    rows = a2d.shape[0]
    tm, tn, tk, grid = _matmul_grid(rows, kd, nd)
    out = pl.pallas_call(
        _gated_linear2_res_kernel,
        out_shape=jax.ShapeDtypeStruct((rows, nd), residual.dtype),
        grid_spec=pltpu.PrefetchScalarGridSpec(
            num_scalar_prefetch=0,
            grid=grid,
            in_specs=[
                pl.BlockSpec((tm, tk), lambda i, j, k: (i, k)),
                pl.BlockSpec((tm, tk), lambda i, j, k: (i, k)),
                pl.BlockSpec((tk, tn), lambda i, j, k: (k, j)),
                pl.BlockSpec((1, tn), lambda i, j, k: (0, j)),
                pl.BlockSpec((tk, tn), lambda i, j, k: (k, j)),
                pl.BlockSpec((1, tn), lambda i, j, k: (0, j)),
                pl.BlockSpec((tm, tn), lambda i, j, k: (i, j)),
            ],
            out_specs=pl.BlockSpec((tm, tn), lambda i, j, k: (i, j)),
            scratch_shapes=[pltpu.VMEM((tm, tn), jnp.float32),
                            pltpu.VMEM((tm, tn), jnp.float32)],
        ),
        compiler_params=pltpu.CompilerParams(
            dimension_semantics=_MM_SEMANTICS,
            vmem_limit_bytes=_VMEM_LIMIT_BYTES),
        cost_estimate=pl.CostEstimate(
            flops=int(4 * rows * kd * nd + rows * nd),
            transcendentals=int(rows * nd),
            bytes_accessed=int(4 * (2 * rows * kd + 2 * kd * nd + 2 * rows * nd + 2 * nd))),
    )(a2d, b2d, wa, ba.reshape(1, nd), wb, bb.reshape(1, nd), r2d)
    return out.reshape(*orig_shape[:-1], nd)


def linear_residual(x, w, bias, residual):
    """x @ w + bias + residual, fused."""
    orig_shape = x.shape
    kd = orig_shape[-1]
    nd = w.shape[1]
    x2d = x.reshape(-1, kd)
    r2d = residual.reshape(-1, nd)
    rows = x2d.shape[0]
    tm, tn, tk, grid = _matmul_grid(rows, kd, nd)
    out = pl.pallas_call(
        _linear_res_kernel,
        out_shape=jax.ShapeDtypeStruct((rows, nd), residual.dtype),
        grid_spec=pltpu.PrefetchScalarGridSpec(
            num_scalar_prefetch=0,
            grid=grid,
            in_specs=[
                pl.BlockSpec((tm, tk), lambda i, j, k: (i, k)),
                pl.BlockSpec((tk, tn), lambda i, j, k: (k, j)),
                pl.BlockSpec((1, tn), lambda i, j, k: (0, j)),
                pl.BlockSpec((tm, tn), lambda i, j, k: (i, j)),
            ],
            out_specs=pl.BlockSpec((tm, tn), lambda i, j, k: (i, j)),
            scratch_shapes=[pltpu.VMEM((tm, tn), jnp.float32)],
        ),
        compiler_params=pltpu.CompilerParams(
            dimension_semantics=_MM_SEMANTICS,
            vmem_limit_bytes=_VMEM_LIMIT_BYTES),
        cost_estimate=pl.CostEstimate(
            flops=int(2 * rows * kd * nd + 2 * rows * nd),
            transcendentals=0,
            bytes_accessed=int(4 * (rows * kd + kd * nd + 2 * rows * nd + nd))),
    )(x2d, w, bias.reshape(1, nd), r2d)
    return out.reshape(*orig_shape[:-1], nd)


# ---------------------------------------------------------------------------
# SConvBlock forward
# ---------------------------------------------------------------------------
def sconv_block_forward(x, params, eps=1e-6):
    """Forward pass of SConvBlock (eval mode: dropout = identity)."""
    batch, length, dim = x.shape
    in_dtype = x.dtype

    # ---- SConv half: x = dropout(sconv(norm_sconv(x))) + x ----
    x_resid = x
    xn = rmsnorm(x, params["norm_sconv_w"], eps)
    xf = xn.astype(jnp.float32)                                   # SConvLayer: x = x.to(float)

    # z = fc_z(x) * SiLU(fc_z_act(x))  (fused Pallas gated-linear)
    z = gated_linear(xf, params["w_z"], params["b_z"], params["w_z_act"], params["b_z_act"])

    # Complex "phazor" convolution via FFT.
    # TODO(synk): torch.fft.fft/ifft has no Pallas TPU equivalent; kept as plain-JAX (XLA FFT) glue.
    ln_phazor = params["phazor_angle_scale"] * 1j - 1e-5                         # (dim,) complex64
    phazor_prog = jnp.exp(jnp.arange(length)[:, None] * ln_phazor[None, :])      # (len, dim)
    phazor_prog_fft = jnp.fft.fft(phazor_prog, n=2 * length, axis=0)
    z_fft = jnp.fft.fft(z.astype(jnp.complex64), n=2 * length, axis=1)
    # NOTE: ifft over axis 0 and slice over axis 1 mirror the reference module verbatim.
    h_inner = jnp.fft.ifft(z_fft * phazor_prog_fft[None, :, :], axis=0)[:, :length, :]
    last_conv = jnp.broadcast_to(params["last_conv_init"][None, :], (batch, dim))
    h_cross = last_conv[:, None, :] * phazor_prog[None, :, :] * jnp.exp(ln_phazor)[None, None, :]
    h = h_inner + h_cross
    # (self.last_conv would refresh to h[:, -1, :]; the forward output does not depend on it.)

    hn = rmsnorm(jnp.real(h).astype(jnp.float32), params["sconv_norm_w"], eps)
    # y = fc_y(norm(h.real)) * SiLU(fc_y_act(x)); dropout=identity; + residual (fused in one kernel)
    x = gated_linear2_residual(hn, xf, params["w_y"], params["b_y"],
                               params["w_y_act"], params["b_y_act"], x_resid)
    x = x.astype(in_dtype)

    # ---- FFN half: x = dropout(ffn(norm_ffn(x))) + x ----
    x_resid = x
    xn2 = rmsnorm(x, params["norm_ffn_w"], eps)
    g = gated_linear(xn2, params["w_fc"], params["b_fc"], params["w_fc_act"], params["b_fc_act"])
    x = linear_residual(g, params["w_fc_out"], params["b_fc_out"], x_resid)
    return x.astype(in_dtype)


# ---------------------------------------------------------------------------
# Pure-JAX reference (for correctness check) and parameter init
# ---------------------------------------------------------------------------
def _rmsnorm_ref(x, w, eps=1e-6):
    x32 = x.astype(jnp.float32)
    y = x32 * jax.lax.rsqrt(jnp.mean(x32 * x32, axis=-1, keepdims=True) + eps)
    return y.astype(x.dtype) * w


def _linear_ref(x, w, b):
    return jnp.dot(x, w, precision=jax.lax.Precision.HIGHEST) + b


def sconv_block_ref(x, params, eps=1e-6):
    batch, length, dim = x.shape
    in_dtype = x.dtype
    x_resid = x
    xf = _rmsnorm_ref(x, params["norm_sconv_w"], eps).astype(jnp.float32)
    z = (_linear_ref(xf, params["w_z"], params["b_z"])
         * jax.nn.silu(_linear_ref(xf, params["w_z_act"], params["b_z_act"])))
    ln_phazor = params["phazor_angle_scale"] * 1j - 1e-5
    phazor_prog = jnp.exp(jnp.arange(length)[:, None] * ln_phazor[None, :])
    phazor_prog_fft = jnp.fft.fft(phazor_prog, n=2 * length, axis=0)
    z_fft = jnp.fft.fft(z.astype(jnp.complex64), n=2 * length, axis=1)
    h_inner = jnp.fft.ifft(z_fft * phazor_prog_fft[None, :, :], axis=0)[:, :length, :]
    last_conv = jnp.broadcast_to(params["last_conv_init"][None, :], (batch, dim))
    h_cross = last_conv[:, None, :] * phazor_prog[None, :, :] * jnp.exp(ln_phazor)[None, None, :]
    h = h_inner + h_cross
    hn = _rmsnorm_ref(jnp.real(h).astype(jnp.float32), params["sconv_norm_w"], eps)
    y = (_linear_ref(hn, params["w_y"], params["b_y"])
         * jax.nn.silu(_linear_ref(xf, params["w_y_act"], params["b_y_act"])))
    x = y.astype(in_dtype) + x_resid
    x_resid = x
    xn2 = _rmsnorm_ref(x, params["norm_ffn_w"], eps)
    g = (_linear_ref(xn2, params["w_fc"], params["b_fc"])
         * jax.nn.silu(_linear_ref(xn2, params["w_fc_act"], params["b_fc_act"])))
    out = _linear_ref(g, params["w_fc_out"], params["b_fc_out"]) + x_resid
    return out.astype(in_dtype)


def init_params(key, dim, dim_ff_hidden, dtype=jnp.float32):
    ks = jax.random.split(key, 12)

    def linear_w(k, fan_in, fan_out):
        return (jax.random.normal(k, (fan_in, fan_out), dtype) / jnp.sqrt(float(fan_in))).astype(dtype)

    p = {}
    # SConvLayer (weights stored pre-transposed as (in, out); reference init uses zero biases)
    p["w_z"] = linear_w(ks[0], dim, dim);      p["b_z"] = jnp.zeros((dim,), dtype)
    p["w_z_act"] = linear_w(ks[1], dim, dim);  p["b_z_act"] = jnp.zeros((dim,), dtype)
    p["w_y"] = linear_w(ks[2], dim, dim);      p["b_y"] = jnp.zeros((dim,), dtype)
    p["w_y_act"] = linear_w(ks[3], dim, dim);  p["b_y_act"] = jnp.zeros((dim,), dtype)
    p["phazor_angle_scale"] = (0.001 ** jnp.linspace(0.0, 1.0, dim)).astype(jnp.float32)
    lc = jax.random.normal(ks[4], (dim, 2), jnp.float32)
    p["last_conv_init"] = (lc[:, 0] + 1j * lc[:, 1]).astype(jnp.complex64)
    p["sconv_norm_w"] = jnp.ones((dim,), jnp.float32)
    # FFNSwiGLU
    p["w_fc"] = linear_w(ks[5], dim, dim_ff_hidden)
    p["b_fc"] = 0.01 * jax.random.normal(ks[6], (dim_ff_hidden,), dtype)
    p["w_fc_act"] = linear_w(ks[7], dim, dim_ff_hidden)
    p["b_fc_act"] = 0.01 * jax.random.normal(ks[8], (dim_ff_hidden,), dtype)
    p["w_fc_out"] = linear_w(ks[9], dim_ff_hidden, dim)
    p["b_fc_out"] = 0.01 * jax.random.normal(ks[10], (dim,), dtype)
    # SConvBlock norms
    p["norm_sconv_w"] = jnp.ones((dim,), jnp.float32)
    p["norm_ffn_w"] = jnp.ones((dim,), jnp.float32)
    return p


if __name__ == "__main__":
    key = jax.random.PRNGKey(0)
    k_x, k_p = jax.random.split(key)
    # Small shapes; feature dims chosen lane-dense (multiples of 128) per TPU layout rules.
    batch, seq, dim, dim_ff_hidden = 2, 8, 128, 256
    x = jax.random.normal(k_x, (batch, seq, dim), dtype=jnp.float32)
    params = init_params(k_p, dim, dim_ff_hidden)

    out = jax.block_until_ready(jax.jit(sconv_block_forward)(x, params))
    ref = sconv_block_ref(x, params)

    assert out.shape == x.shape
    max_err = float(jnp.max(jnp.abs(out - ref)))
    assert jnp.allclose(out, ref, atol=2e-2, rtol=2e-2), f"mismatch vs reference (max |err|={max_err})"
    print("KERNEL_OK")
</pallas_src>

<mosaic_0001>
module attributes {stable_mosaic.version = 11 : i64} {
  func.func @_rmsnorm_kernel(%arg0: i32, %arg1: memref<16x128xf32, #tpu.memory_space<vmem>>, %arg2: memref<1x128xf32, #tpu.memory_space<vmem>>, %arg3: memref<16x128xf32, #tpu.memory_space<vmem>>) attributes {dimension_semantics = [#tpu.dimension_semantics<parallel>], iteration_bounds = array<i64: 1>, scalar_prefetch = 0 : i64, scratch_operands = 0 : i64, tpu.core_type = #tpu.core_type<tc>, window_params = [{transform_indices = @transform_0, window_bounds = array<i64: 16, 128>}, {pipeline_mode = #tpu.pipeline_mode<synchronous>, transform_indices = @transform_1, window_bounds = array<i64: 1, 128>}, {transform_indices = @transform_2, window_bounds = array<i64: 16, 128>}]} {
    %c0 = arith.constant 0 : index
    %c0_0 = arith.constant 0 : index
    %0 = vector.load %arg1[%c0, %c0_0] : memref<16x128xf32, #tpu.memory_space<vmem>>, vector<16x128xf32>
    %1 = arith.mulf %0, %0 : vector<16x128xf32>
    %cst = arith.constant dense<0.000000e+00> : vector<16xf32>
    %2 = vector.multi_reduction <add>, %1, %cst [1] : vector<16x128xf32> to vector<16xf32>
    %3 = vector.shape_cast %2 : vector<16xf32> to vector<16x1xf32>
    %cst_1 = arith.constant 7.812500e-03 : f32
    %4 = vector.broadcast %cst_1 : f32 to vector<16x1xf32>
    %5 = arith.mulf %3, %4 : vector<16x1xf32>
    %cst_2 = arith.constant 9.99999997E-7 : f32
    %6 = vector.broadcast %cst_2 : f32 to vector<16x1xf32>
    %7 = arith.addf %5, %6 : vector<16x1xf32>
    %8 = math.rsqrt %7 : vector<16x1xf32>
    %9 = vector.broadcast %8 : vector<16x1xf32> to vector<16x128xf32>
    %10 = arith.mulf %0, %9 : vector<16x128xf32>
    %c0_3 = arith.constant 0 : index
    %c0_4 = arith.constant 0 : index
    %11 = vector.load %arg2[%c0_3, %c0_4] : memref<1x128xf32, #tpu.memory_space<vmem>>, vector<1x128xf32>
    %12 = vector.broadcast %11 : vector<1x128xf32> to vector<16x128xf32>
    %13 = arith.mulf %10, %12 : vector<16x128xf32>
    %c0_5 = arith.constant 0 : index
    %c0_6 = arith.constant 0 : index
    %14 = vector.load %arg3[%c0_5, %c0_6] : memref<16x128xf32, #tpu.memory_space<vmem>>, vector<16x128xf32>
    tpu.vector_store %arg3[%c0_5, %c0_6], %13 {strides = array<i32>} : memref<16x128xf32, #tpu.memory_space<vmem>>, vector<16x128xf32>,
    return
  }
  func.func @transform_0(%arg0: i32) -> (i32, i32) {
    %c0_i32 = arith.constant 0 : i32
    %c0_i32_0 = arith.constant 0 : i32
    return %arg0, %c0_i32 : i32, i32
  }
  func.func @transform_1(%arg0: i32) -> (i32, i32) {
    %c0_i32 = arith.constant 0 : i32
    %c0_i32_0 = arith.constant 0 : i32
    %c0_i32_1 = arith.constant 0 : i32
    return %c0_i32, %c0_i32_0 : i32, i32
  }
  func.func @transform_2(%arg0: i32) -> (i32, i32) {
    %c0_i32 = arith.constant 0 : i32
    %c0_i32_0 = arith.constant 0 : i32
    return %arg0, %c0_i32 : i32, i32
  }
}

module attributes {stable_mosaic.version = 11 : i64} {
  func.func @_gated_linear_kernel(%arg0: i32, %arg1: i32, %arg2: i32, %arg3: memref<16x128xf32, #tpu.memory_space<vmem>>, %arg4: memref<128x128xf32, #tpu.memory_space<vmem>>, %arg5: memref<1x128xf32, #tpu.memory_space<vmem>>, %arg6: memref<128x128xf32, #tpu.memory_space<vmem>>, %arg7: memref<1x128xf32, #tpu.memory_space<vmem>>, %arg8: memref<16x128xf32, #tpu.memory_space<vmem>>, %arg9: memref<16x128xf32, #tpu.memory_space<vmem>>, %arg10: memref<16x128xf32, #tpu.memory_space<vmem>>) attributes {dimension_semantics = [#tpu.dimension_semantics<parallel>, #tpu.dimension_semantics<parallel>, #tpu.dimension_semantics<arbitrary>], iteration_bounds = array<i64: 1, 1, 1>, scalar_prefetch = 0 : i64, scratch_operands = 2 : i64, tpu.core_type = #tpu.core_type<tc>, window_params = [{transform_indices = @transform_0, window_bounds = array<i64: 16, 128>}, {transform_indices = @transform_1, window_bounds = array<i64: 128, 128>}, {transform_indices = @transform_2, window_bounds = array<i64: 1, 128>}, {transform_indices = @transform_3, window_bounds = array<i64: 128, 128>}, {transform_indices = @transform_4, window_bounds = array<i64: 1, 128>}, {transform_indices = @transform_5, window_bounds = array<i64: 16, 128>}]} {
    %c0_i32 = arith.constant 0 : i32
    %0 = arith.cmpi eq, %arg2, %c0_i32 : i32
    %1 = arith.extui %0 : i1 to i32
    %c0_i32_0 = arith.constant 0 : i32
    %2 = arith.cmpi ne, %1, %c0_i32_0 : i32
    scf.if %2 {
      %cst_17 = arith.constant 0.000000e+00 : f32
      %17 = vector.broadcast %cst_17 : f32 to vector<16x128xf32>
      %c0_18 = arith.constant 0 : index
      %c0_19 = arith.constant 0 : index
      %18 = vector.load %arg9[%c0_18, %c0_19] : memref<16x128xf32, #tpu.memory_space<vmem>>, vector<16x128xf32>
      tpu.vector_store %arg9[%c0_18, %c0_19], %17 {strides = array<i32>} : memref<16x128xf32, #tpu.memory_space<vmem>>, vector<16x128xf32>,
      %cst_20 = arith.constant 0.000000e+00 : f32
      %19 = vector.broadcast %cst_20 : f32 to vector<16x128xf32>
      %c0_21 = arith.constant 0 : index
      %c0_22 = arith.constant 0 : index
      %20 = vector.load %arg10[%c0_21, %c0_22] : memref<16x128xf32, #tpu.memory_space<vmem>>, vector<16x128xf32>
      tpu.vector_store %arg10[%c0_21, %c0_22], %19 {strides = array<i32>} : memref<16x128xf32, #tpu.memory_space<vmem>>, vector<16x128xf32>,
    } else {
    }
    %c0 = arith.constant 0 : index
    %c0_1 = arith.constant 0 : index
    %3 = vector.load %arg3[%c0, %c0_1] : memref<16x128xf32, #tpu.memory_space<vmem>>, vector<16x128xf32>
    %c0_2 = arith.constant 0 : index
    %c0_3 = arith.constant 0 : index
    %4 = vector.load %arg9[%c0_2, %c0_3] : memref<16x128xf32, #tpu.memory_space<vmem>>, vector<16x128xf32>
    %c0_4 = arith.constant 0 : index
    %c0_5 = arith.constant 0 : index
    %5 = vector.load %arg4[%c0_4, %c0_5] : memref<128x128xf32, #tpu.memory_space<vmem>>, vector<128x128xf32>
    %cst = arith.constant dense<0.000000e+00> : vector<16x128xf32>
    %6 = tpu.matmul %3, %5, %cst {dimension_numbers = #tpu.dot_dimension_numbers<[1], [0], [0], [1], [0, 0, 1, 1], [], []>} : vector<16x128xf32>, vector<128x128xf32>, vector<16x128xf32> -> vector<16x128xf32>
    %7 = arith.addf %4, %6 : vector<16x128xf32>
    %c0_6 = arith.constant 0 : index
    %c0_7 = arith.constant 0 : index
    %8 = vector.load %arg9[%c0_6, %c0_7] : memref<16x128xf32, #tpu.memory_space<vmem>>, vector<16x128xf32>
    tpu.vector_store %arg9[%c0_6, %c0_7], %7 {strides = array<i32>} : memref<16x128xf32, #tpu.memory_space<vmem>>, vector<16x128xf32>,
    %c0_8 = arith.constant 0 : index
    %c0_9 = arith.constant 0 : index
    %9 = vector.load %arg10[%c0_8, %c0_9] : memref<16x128xf32, #tpu.memory_space<vmem>>, vector<16x128xf32>
    %c0_10 = arith.constant 0 : index
    %c0_11 = arith.constant 0 : index
    %10 = vector.load %arg6[%c0_10, %c0_11] : memref<128x128xf32, #tpu.memory_space<vmem>>, vector<128x128xf32>
    %cst_12 = arith.constant dense<0.000000e+00> : vector<16x128xf32>
    %11 = tpu.matmul %3, %10, %cst_12 {dimension_numbers = #tpu.dot_dimension_numbers<[1], [0], [0], [1], [0, 0, 1, 1], [], []>} : vector<16x128xf32>, vector<128x128xf32>, vector<16x128xf32> -> vector<16x128xf32>
    %12 = arith.addf %9, %11 : vector<16x128xf32>
    %c0_13 = arith.constant 0 : index
    %c0_14 = arith.constant 0 : index
    %13 = vector.load %arg10[%c0_13, %c0_14] : memref<16x128xf32, #tpu.memory_space<vmem>>, vector<16x128xf32>
    tpu.vector_store %arg10[%c0_13, %c0_14], %12 {strides = array<i32>} : memref<16x128xf32, #tpu.memory_space<vmem>>, vector<16x128xf32>,
    %c0_i32_15 = arith.constant 0 : i32
    %14 = arith.cmpi eq, %arg2, %c0_i32_15 : i32
    %15 = arith.extui %14 : i1 to i32
    %c0_i32_16 = arith.constant 0 : i32
    %16 = arith.cmpi ne, %15, %c0_i32_16 : i32
    scf.if %16 {
      %c0_17 = arith.constant 0 : index
      %c0_18 = arith.constant 0 : index
      %17 = vector.load %arg9[%c0_17, %c0_18] : memref<16x128xf32, #tpu.memory_space<vmem>>, vector<16x128xf32>
      %c0_19 = arith.constant 0 : index
      %c0_20 = arith.constant 0 : index
      %18 = vector.load %arg5[%c0_19, %c0_20] : memref<1x128xf32, #tpu.memory_space<vmem>>, vector<1x128xf32>
      %19 = vector.broadcast %18 : vector<1x128xf32> to vector<16x128xf32>
      %20 = arith.addf %17, %19 : vector<16x128xf32>
      %c0_21 = arith.constant 0 : index
      %c0_22 = arith.constant 0 : index
      %21 = vector.load %arg10[%c0_21, %c0_22] : memref<16x128xf32, #tpu.memory_space<vmem>>, vector<16x128xf32>
      %c0_23 = arith.constant 0 : index
      %c0_24 = arith.constant 0 : index
      %22 = vector.load %arg7[%c0_23, %c0_24] : memref<1x128xf32, #tpu.memory_space<vmem>>, vector<1x128xf32>
      %23 = vector.broadcast %22 : vector<1x128xf32> to vector<16x128xf32>
      %24 = arith.addf %21, %23 : vector<16x128xf32>
      %25 = arith.negf %24 : vector<16x128xf32>
      %26 = math.exp %25 : vector<16x128xf32>
      %cst_25 = arith.constant 1.000000e+00 : f32
      %27 = vector.broadcast %cst_25 : f32 to vector<16x128xf32>
      %28 = arith.addf %27, %26 : vector<16x128xf32>
      %29 = arith.divf %27, %28 : vector<16x128xf32>
      %30 = arith.mulf %24, %29 : vector<16x128xf32>
      %31 = arith.mulf %20, %30 : vector<16x128xf32>
      %c0_26 = arith.constant 0 : index
      %c0_27 = arith.constant 0 : index
      %32 = vector.load %arg8[%c0_26, %c0_27] : memref<16x128xf32, #tpu.memory_space<vmem>>, vector<16x128xf32>
      tpu.vector_store %arg8[%c0_26, %c0_27], %31 {strides = array<i32>} : memref<16x128xf32, #tpu.memory_space<vmem>>, vector<16x128xf32>,
    } else {
    }
    return
  }
  func.func @transform_0(%arg0: i32, %arg1: i32, %arg2: i32) -> (i32, i32) {
    %c0_i32 = arith.constant 0 : i32
    return %arg0, %arg2 : i32, i32
  }
  func.func @transform_1(%arg0: i32, %arg1: i32, %arg2: i32) -> (i32, i32) {
    %c0_i32 = arith.constant 0 : i32
    return %arg2, %arg1 : i32, i32
  }
  func.func @transform_2(%arg0: i32, %arg1: i32, %arg2: i32) -> (i32, i32) {
    %c0_i32 = arith.constant 0 : i32
    %c0_i32_0 = arith.constant 0 : i32
    return %c0_i32, %arg1 : i32, i32
  }
  func.func @transform_3(%arg0: i32, %arg1: i32, %arg2: i32) -> (i32, i32) {
    %c0_i32 = arith.constant 0 : i32
    return %arg2, %arg1 : i32, i32
  }
  func.func @transform_4(%arg0: i32, %arg1: i32, %arg2: i32) -> (i32, i32) {
    %c0_i32 = arith.constant 0 : i32
    %c0_i32_0 = arith.constant 0 : i32
    return %c0_i32, %arg1 : i32, i32
  }
  func.func @transform_5(%arg0: i32, %arg1: i32, %arg2: i32) -> (i32, i32) {
    %c0_i32 = arith.constant 0 : i32
    return %arg0, %arg1 : i32, i32
  }
}

module attributes {stable_mosaic.version = 11 : i64} {
  func.func @_gated_linear_kernel(%arg0: i32, %arg1: i32, %arg2: i32, %arg3: memref<16x128xf32, #tpu.memory_space<vmem>>, %arg4: memref<128x256xf32, #tpu.memory_space<vmem>>, %arg5: memref<1x256xf32, #tpu.memory_space<vmem>>, %arg6: memref<128x256xf32, #tpu.memory_space<vmem>>, %arg7: memref<1x256xf32, #tpu.memory_space<vmem>>, %arg8: memref<16x256xf32, #tpu.memory_space<vmem>>, %arg9: memref<16x256xf32, #tpu.memory_space<vmem>>, %arg10: memref<16x256xf32, #tpu.memory_space<vmem>>) attributes {dimension_semantics = [#tpu.dimension_semantics<parallel>, #tpu.dimension_semantics<parallel>, #tpu.dimension_semantics<arbitrary>], iteration_bounds = array<i64: 1, 1, 1>, scalar_prefetch = 0 : i64, scratch_operands = 2 : i64, tpu.core_type = #tpu.core_type<tc>, window_params = [{transform_indices = @transform_0, window_bounds = array<i64: 16, 128>}, {transform_indices = @transform_1, window_bounds = array<i64: 128, 256>}, {transform_indices = @transform_2, window_bounds = array<i64: 1, 256>}, {transform_indices = @transform_3, window_bounds = array<i64: 128, 256>}, {transform_indices = @transform_4, window_bounds = array<i64: 1, 256>}, {transform_indices = @transform_5, window_bounds = array<i64: 16, 256>}]} {
    %c0_i32 = arith.constant 0 : i32
    %0 = arith.cmpi eq, %arg2, %c0_i32 : i32
    %1 = arith.extui %0 : i1 to i32
    %c0_i32_0 = arith.constant 0 : i32
    %2 = arith.cmpi ne, %1, %c0_i32_0 : i32
    scf.if %2 {
      %cst_17 = arith.constant 0.000000e+00 : f32
      %17 = vector.broadcast %cst_17 : f32 to vector<16x256xf32>
      %c0_18 = arith.constant 0 : index
      %c0_19 = arith.constant 0 : index
      %18 = vector.load %arg9[%c0_18, %c0_19] : memref<16x256xf32, #tpu.memory_space<vmem>>, vector<16x256xf32>
      tpu.vector_store %arg9[%c0_18, %c0_19], %17 {strides = array<i32>} : memref<16x256xf32, #tpu.memory_space<vmem>>, vector<16x256xf32>,
      %cst_20 = arith.constant 0.000000e+00 : f32
      %19 = vector.broadcast %cst_20 : f32 to vector<16x256xf32>
      %c0_21 = arith.constant 0 : index
      %c0_22 = arith.constant 0 : index
      %20 = vector.load %arg10[%c0_21, %c0_22] : memref<16x256xf32, #tpu.memory_space<vmem>>, vector<16x256xf32>
      tpu.vector_store %arg10[%c0_21, %c0_22], %19 {strides = array<i32>} : memref<16x256xf32, #tpu.memory_space<vmem>>, vector<16x256xf32>,
    } else {
    }
    %c0 = arith.constant 0 : index
    %c0_1 = arith.constant 0 : index
    %3 = vector.load %arg3[%c0, %c0_1] : memref<16x128xf32, #tpu.memory_space<vmem>>, vector<16x128xf32>
    %c0_2 = arith.constant 0 : index
    %c0_3 = arith.constant 0 : index
    %4 = vector.load %arg9[%c0_2, %c0_3] : memref<16x256xf32, #tpu.memory_space<vmem>>, vector<16x256xf32>
    %c0_4 = arith.constant 0 : index
    %c0_5 = arith.constant 0 : index
    %5 = vector.load %arg4[%c0_4, %c0_5] : memref<128x256xf32, #tpu.memory_space<vmem>>, vector<128x256xf32>
    %cst = arith.constant dense<0.000000e+00> : vector<16x256xf32>
    %6 = tpu.matmul %3, %5, %cst {dimension_numbers = #tpu.dot_dimension_numbers<[1], [0], [0], [1], [0, 0, 1, 1], [], []>} : vector<16x128xf32>, vector<128x256xf32>, vector<16x256xf32> -> vector<16x256xf32>
    %7 = arith.addf %4, %6 : vector<16x256xf32>
    %c0_6 = arith.constant 0 : index
    %c0_7 = arith.constant 0 : index
    %8 = vector.load %arg9[%c0_6, %c0_7] : memref<16x256xf32, #tpu.memory_space<vmem>>, vector<16x256xf32>
    tpu.vector_store %arg9[%c0_6, %c0_7], %7 {strides = array<i32>} : memref<16x256xf32, #tpu.memory_space<vmem>>, vector<16x256xf32>,
    %c0_8 = arith.constant 0 : index
    %c0_9 = arith.constant 0 : index
    %9 = vector.load %arg10[%c0_8, %c0_9] : memref<16x256xf32, #tpu.memory_space<vmem>>, vector<16x256xf32>
    %c0_10 = arith.constant 0 : index
    %c0_11 = arith.constant 0 : index
    %10 = vector.load %arg6[%c0_10, %c0_11] : memref<128x256xf32, #tpu.memory_space<vmem>>, vector<128x256xf32>
    %cst_12 = arith.constant dense<0.000000e+00> : vector<16x256xf32>
    %11 = tpu.matmul %3, %10, %cst_12 {dimension_numbers = #tpu.dot_dimension_numbers<[1], [0], [0], [1], [0, 0, 1, 1], [], []>} : vector<16x128xf32>, vector<128x256xf32>, vector<16x256xf32> -> vector<16x256xf32>
    %12 = arith.addf %9, %11 : vector<16x256xf32>
    %c0_13 = arith.constant 0 : index
    %c0_14 = arith.constant 0 : index
    %13 = vector.load %arg10[%c0_13, %c0_14] : memref<16x256xf32, #tpu.memory_space<vmem>>, vector<16x256xf32>
    tpu.vector_store %arg10[%c0_13, %c0_14], %12 {strides = array<i32>} : memref<16x256xf32, #tpu.memory_space<vmem>>, vector<16x256xf32>,
    %c0_i32_15 = arith.constant 0 : i32
    %14 = arith.cmpi eq, %arg2, %c0_i32_15 : i32
    %15 = arith.extui %14 : i1 to i32
    %c0_i32_16 = arith.constant 0 : i32
    %16 = arith.cmpi ne, %15, %c0_i32_16 : i32
    scf.if %16 {
      %c0_17 = arith.constant 0 : index
      %c0_18 = arith.constant 0 : index
      %17 = vector.load %arg9[%c0_17, %c0_18] : memref<16x256xf32, #tpu.memory_space<vmem>>, vector<16x256xf32>
      %c0_19 = arith.constant 0 : index
      %c0_20 = arith.constant 0 : index
      %18 = vector.load %arg5[%c0_19, %c0_20] : memref<1x256xf32, #tpu.memory_space<vmem>>, vector<1x256xf32>
      %19 = vector.broadcast %18 : vector<1x256xf32> to vector<16x256xf32>
      %20 = arith.addf %17, %19 : vector<16x256xf32>
      %c0_21 = arith.constant 0 : index
      %c0_22 = arith.constant 0 : index
      %21 = vector.load %arg10[%c0_21, %c0_22] : memref<16x256xf32, #tpu.memory_space<vmem>>, vector<16x256xf32>
      %c0_23 = arith.constant 0 : index
      %c0_24 = arith.constant 0 : index
      %22 = vector.load %arg7[%c0_23, %c0_24] : memref<1x256xf32, #tpu.memory_space<vmem>>, vector<1x256xf32>
      %23 = vector.broadcast %22 : vector<1x256xf32> to vector<16x256xf32>
      %24 = arith.addf %21, %23 : vector<16x256xf32>
      %25 = arith.negf %24 : vector<16x256xf32>
      %26 = math.exp %25 : vector<16x256xf32>
      %cst_25 = arith.constant 1.000000e+00 : f32
      %27 = vector.broadcast %cst_25 : f32 to vector<16x256xf32>
      %28 = arith.addf %27, %26 : vector<16x256xf32>
      %29 = arith.divf %27, %28 : vector<16x256xf32>
      %30 = arith.mulf %24, %29 : vector<16x256xf32>
      %31 = arith.mulf %20, %30 : vector<16x256xf32>
      %c0_26 = arith.constant 0 : index
      %c0_27 = arith.constant 0 : index
      %32 = vector.load %arg8[%c0_26, %c0_27] : memref<16x256xf32, #tpu.memory_space<vmem>>, vector<16x256xf32>
      tpu.vector_store %arg8[%c0_26, %c0_27], %31 {strides = array<i32>} : memref<16x256xf32, #tpu.memory_space<vmem>>, vector<16x256xf32>,
    } else {
    }
    return
  }
  func.func @transform_0(%arg0: i32, %arg1: i32, %arg2: i32) -> (i32, i32) {
    %c0_i32 = arith.constant 0 : i32
    return %arg0, %arg2 : i32, i32
  }
  func.func @transform_1(%arg0: i32, %arg1: i32, %arg2: i32) -> (i32, i32) {
    %c0_i32 = arith.constant 0 : i32
    return %arg2, %arg1 : i32, i32
  }
  func.func @transform_2(%arg0: i32, %arg1: i32, %arg2: i32) -> (i32, i32) {
    %c0_i32 = arith.constant 0 : i32
    %c0_i32_0 = arith.constant 0 : i32
    return %c0_i32, %arg1 : i32, i32
  }
  func.func @transform_3(%arg0: i32, %arg1: i32, %arg2: i32) -> (i32, i32) {
    %c0_i32 = arith.constant 0 : i32
    return %arg2, %arg1 : i32, i32
  }
  func.func @transform_4(%arg0: i32, %arg1: i32, %arg2: i32) -> (i32, i32) {
    %c0_i32 = arith.constant 0 : i32
    %c0_i32_0 = arith.constant 0 : i32
    return %c0_i32, %arg1 : i32, i32
  }
  func.func @transform_5(%arg0: i32, %arg1: i32, %arg2: i32) -> (i32, i32) {
    %c0_i32 = arith.constant 0 : i32
    return %arg0, %arg1 : i32, i32
  }
}

module attributes {stable_mosaic.version = 11 : i64} {
  func.func @_gated_linear2_res_kernel(%arg0: i32, %arg1: i32, %arg2: i32, %arg3: memref<16x128xf32, #tpu.memory_space<vmem>>, %arg4: memref<16x128xf32, #tpu.memory_space<vmem>>, %arg5: memref<128x128xf32, #tpu.memory_space<vmem>>, %arg6: memref<1x128xf32, #tpu.memory_space<vmem>>, %arg7: memref<128x128xf32, #tpu.memory_space<vmem>>, %arg8: memref<1x128xf32, #tpu.memory_space<vmem>>, %arg9: memref<16x128xf32, #tpu.memory_space<vmem>>, %arg10: memref<16x128xf32, #tpu.memory_space<vmem>>, %arg11: memref<16x128xf32, #tpu.memory_space<vmem>>, %arg12: memref<16x128xf32, #tpu.memory_space<vmem>>) attributes {dimension_semantics = [#tpu.dimension_semantics<parallel>, #tpu.dimension_semantics<parallel>, #tpu.dimension_semantics<arbitrary>], iteration_bounds = array<i64: 1, 1, 1>, scalar_prefetch = 0 : i64, scratch_operands = 2 : i64, tpu.core_type = #tpu.core_type<tc>, window_params = [{transform_indices = @transform_0, window_bounds = array<i64: 16, 128>}, {transform_indices = @transform_1, window_bounds = array<i64: 16, 128>}, {transform_indices = @transform_2, window_bounds = array<i64: 128, 128>}, {transform_indices = @transform_3, window_bounds = array<i64: 1, 128>}, {transform_indices = @transform_4, window_bounds = array<i64: 128, 128>}, {transform_indices = @transform_5, window_bounds = array<i64: 1, 128>}, {transform_indices = @transform_6, window_bounds = array<i64: 16, 128>}, {transform_indices = @transform_7, window_bounds = array<i64: 16, 128>}]} {
    %c0_i32 = arith.constant 0 : i32
    %0 = arith.cmpi eq, %arg2, %c0_i32 : i32
    %1 = arith.extui %0 : i1 to i32
    %c0_i32_0 = arith.constant 0 : i32
    %2 = arith.cmpi ne, %1, %c0_i32_0 : i32
    scf.if %2 {
      %cst_19 = arith.constant 0.000000e+00 : f32
      %18 = vector.broadcast %cst_19 : f32 to vector<16x128xf32>
      %c0_20 = arith.constant 0 : index
      %c0_21 = arith.constant 0 : index
      %19 = vector.load %arg11[%c0_20, %c0_21] : memref<16x128xf32, #tpu.memory_space<vmem>>, vector<16x128xf32>
      tpu.vector_store %arg11[%c0_20, %c0_21], %18 {strides = array<i32>} : memref<16x128xf32, #tpu.memory_space<vmem>>, vector<16x128xf32>,
      %cst_22 = arith.constant 0.000000e+00 : f32
      %20 = vector.broadcast %cst_22 : f32 to vector<16x128xf32>
      %c0_23 = arith.constant 0 : index
      %c0_24 = arith.constant 0 : index
      %21 = vector.load %arg12[%c0_23, %c0_24] : memref<16x128xf32, #tpu.memory_space<vmem>>, vector<16x128xf32>
      tpu.vector_store %arg12[%c0_23, %c0_24], %20 {strides = array<i32>} : memref<16x128xf32, #tpu.memory_space<vmem>>, vector<16x128xf32>,
    } else {
    }
    %c0 = arith.constant 0 : index
    %c0_1 = arith.constant 0 : index
    %3 = vector.load %arg11[%c0, %c0_1] : memref<16x128xf32, #tpu.memory_space<vmem>>, vector<16x128xf32>
    %c0_2 = arith.constant 0 : index
    %c0_3 = arith.constant 0 : index
    %4 = vector.load %arg3[%c0_2, %c0_3] : memref<16x128xf32, #tpu.memory_space<vmem>>, vector<16x128xf32>
    %c0_4 = arith.constant 0 : index
    %c0_5 = arith.constant 0 : index
    %5 = vector.load %arg5[%c0_4, %c0_5] : memref<128x128xf32, #tpu.memory_space<vmem>>, vector<128x128xf32>
    %cst = arith.constant dense<0.000000e+00> : vector<16x128xf32>
    %6 = tpu.matmul %4, %5, %cst {dimension_numbers = #tpu.dot_dimension_numbers<[1], [0], [0], [1], [0, 0, 1, 1], [], []>} : vector<16x128xf32>, vector<128x128xf32>, vector<16x128xf32> -> vector<16x128xf32>
    %7 = arith.addf %3, %6 : vector<16x128xf32>
    %c0_6 = arith.constant 0 : index
    %c0_7 = arith.constant 0 : index
    %8 = vector.load %arg11[%c0_6, %c0_7] : memref<16x128xf32, #tpu.memory_space<vmem>>, vector<16x128xf32>
    tpu.vector_store %arg11[%c0_6, %c0_7], %7 {strides = array<i32>} : memref<16x128xf32, #tpu.memory_space<vmem>>, vector<16x128xf32>,
    %c0_8 = arith.constant 0 : index
    %c0_9 = arith.constant 0 : index
    %9 = vector.load %arg12[%c0_8, %c0_9] : memref<16x128xf32, #tpu.memory_space<vmem>>, vector<16x128xf32>
    %c0_10 = arith.constant 0 : index
    %c0_11 = arith.constant 0 : index
    %10 = vector.load %arg4[%c0_10, %c0_11] : memref<16x128xf32, #tpu.memory_space<vmem>>, vector<16x128xf32>
    %c0_12 = arith.constant 0 : index
    %c0_13 = arith.constant 0 : index
    %11 = vector.load %arg7[%c0_12, %c0_13] : memref<128x128xf32, #tpu.memory_space<vmem>>, vector<128x128xf32>
    %cst_14 = arith.constant dense<0.000000e+00> : vector<16x128xf32>
    %12 = tpu.matmul %10, %11, %cst_14 {dimension_numbers = #tpu.dot_dimension_numbers<[1], [0], [0], [1], [0, 0, 1, 1], [], []>} : vector<16x128xf32>, vector<128x128xf32>, vector<16x128xf32> -> vector<16x128xf32>
    %13 = arith.addf %9, %12 : vector<16x128xf32>
    %c0_15 = arith.constant 0 : index
    %c0_16 = arith.constant 0 : index
    %14 = vector.load %arg12[%c0_15, %c0_16] : memref<16x128xf32, #tpu.memory_space<vmem>>, vector<16x128xf32>
    tpu.vector_store %arg12[%c0_15, %c0_16], %13 {strides = array<i32>} : memref<16x128xf32, #tpu.memory_space<vmem>>, vector<16x128xf32>,
    %c0_i32_17 = arith.constant 0 : i32
    %15 = arith.cmpi eq, %arg2, %c0_i32_17 : i32
    %16 = arith.extui %15 : i1 to i32
    %c0_i32_18 = arith.constant 0 : i32
    %17 = arith.cmpi ne, %16, %c0_i32_18 : i32
    scf.if %17 {
      %c0_19 = arith.constant 0 : index
      %c0_20 = arith.constant 0 : index
      %18 = vector.load %arg11[%c0_19, %c0_20] : memref<16x128xf32, #tpu.memory_space<vmem>>, vector<16x128xf32>
      %c0_21 = arith.constant 0 : index
      %c0_22 = arith.constant 0 : index
      %19 = vector.load %arg6[%c0_21, %c0_22] : memref<1x128xf32, #tpu.memory_space<vmem>>, vector<1x128xf32>
      %20 = vector.broadcast %19 : vector<1x128xf32> to vector<16x128xf32>
      %21 = arith.addf %18, %20 : vector<16x128xf32>
      %c0_23 = arith.constant 0 : index
      %c0_24 = arith.constant 0 : index
      %22 = vector.load %arg12[%c0_23, %c0_24] : memref<16x128xf32, #tpu.memory_space<vmem>>, vector<16x128xf32>
      %c0_25 = arith.constant 0 : index
      %c0_26 = arith.constant 0 : index
      %23 = vector.load %arg8[%c0_25, %c0_26] : memref<1x128xf32, #tpu.memory_space<vmem>>, vector<1x128xf32>
      %24 = vector.broadcast %23 : vector<1x128xf32> to vector<16x128xf32>
      %25 = arith.addf %22, %24 : vector<16x128xf32>
      %26 = arith.negf %25 : vector<16x128xf32>
      %27 = math.exp %26 : vector<16x128xf32>
      %cst_27 = arith.constant 1.000000e+00 : f32
      %28 = vector.broadcast %cst_27 : f32 to vector<16x128xf32>
      %29 = arith.addf %28, %27 : vector<16x128xf32>
      %30 = arith.divf %28, %29 : vector<16x128xf32>
      %31 = arith.mulf %25, %30 : vector<16x128xf32>
      %32 = arith.mulf %21, %31 : vector<16x128xf32>
      %c0_28 = arith.constant 0 : index
      %c0_29 = arith.constant 0 : index
      %33 = vector.load %arg9[%c0_28, %c0_29] : memref<16x128xf32, #tpu.memory_space<vmem>>, vector<16x128xf32>
      %34 = arith.addf %32, %33 : vector<16x128xf32>
      %c0_30 = arith.constant 0 : index
      %c0_31 = arith.constant 0 : index
      %35 = vector.load %arg10[%c0_30, %c0_31] : memref<16x128xf32, #tpu.memory_space<vmem>>, vector<16x128xf32>
      tpu.vector_store %arg10[%c0_30, %c0_31], %34 {strides = array<i32>} : memref<16x128xf32, #tpu.memory_space<vmem>>, vector<16x128xf32>,
    } else {
    }
    return
  }
  func.func @transform_0(%arg0: i32, %arg1: i32, %arg2: i32) -> (i32, i32) {
    %c0_i32 = arith.constant 0 : i32
    return %arg0, %arg2 : i32, i32
  }
  func.func @transform_1(%arg0: i32, %arg1: i32, %arg2: i32) -> (i32, i32) {
    %c0_i32 = arith.constant 0 : i32
    return %arg0, %arg2 : i32, i32
  }
  func.func @transform_2(%arg0: i32, %arg1: i32, %arg2: i32) -> (i32, i32) {
    %c0_i32 = arith.constant 0 : i32
    return %arg2, %arg1 : i32, i32
  }
  func.func @transform_3(%arg0: i32, %arg1: i32, %arg2: i32) -> (i32, i32) {
    %c0_i32 = arith.constant 0 : i32
    %c0_i32_0 = arith.constant 0 : i32
    return %c0_i32, %arg1 : i32, i32
  }
  func.func @transform_4(%arg0: i32, %arg1: i32, %arg2: i32) -> (i32, i32) {
    %c0_i32 = arith.constant 0 : i32
    return %arg2, %arg1 : i32, i32
  }
  func.func @transform_5(%arg0: i32, %arg1: i32, %arg2: i32) -> (i32, i32) {
    %c0_i32 = arith.constant 0 : i32
    %c0_i32_0 = arith.constant 0 : i32
    return %c0_i32, %arg1 : i32, i32
  }
  func.func @transform_6(%arg0: i32, %arg1: i32, %arg2: i32) -> (i32, i32) {
    %c0_i32 = arith.constant 0 : i32
    return %arg0, %arg1 : i32, i32
  }
  func.func @transform_7(%arg0: i32, %arg1: i32, %arg2: i32) -> (i32, i32) {
    %c0_i32 = arith.constant 0 : i32
    return %arg0, %arg1 : i32, i32
  }
}

module attributes {stable_mosaic.version = 11 : i64} {
  func.func @_linear_res_kernel(%arg0: i32, %arg1: i32, %arg2: i32, %arg3: memref<16x256xf32, #tpu.memory_space<vmem>>, %arg4: memref<256x128xf32, #tpu.memory_space<vmem>>, %arg5: memref<1x128xf32, #tpu.memory_space<vmem>>, %arg6: memref<16x128xf32, #tpu.memory_space<vmem>>, %arg7: memref<16x128xf32, #tpu.memory_space<vmem>>, %arg8: memref<16x128xf32, #tpu.memory_space<vmem>>) attributes {dimension_semantics = [#tpu.dimension_semantics<parallel>, #tpu.dimension_semantics<parallel>, #tpu.dimension_semantics<arbitrary>], iteration_bounds = array<i64: 1, 1, 1>, scalar_prefetch = 0 : i64, scratch_operands = 1 : i64, tpu.core_type = #tpu.core_type<tc>, window_params = [{transform_indices = @transform_0, window_bounds = array<i64: 16, 256>}, {transform_indices = @transform_1, window_bounds = array<i64: 256, 128>}, {transform_indices = @transform_2, window_bounds = array<i64: 1, 128>}, {transform_indices = @transform_3, window_bounds = array<i64: 16, 128>}, {transform_indices = @transform_4, window_bounds = array<i64: 16, 128>}]} {
    %c0_i32 = arith.constant 0 : i32
    %0 = arith.cmpi eq, %arg2, %c0_i32 : i32
    %1 = arith.extui %0 : i1 to i32
    %c0_i32_0 = arith.constant 0 : i32
    %2 = arith.cmpi ne, %1, %c0_i32_0 : i32
    scf.if %2 {
      %cst_10 = arith.constant 0.000000e+00 : f32
      %12 = vector.broadcast %cst_10 : f32 to vector<16x128xf32>
      %c0_11 = arith.constant 0 : index
      %c0_12 = arith.constant 0 : index
      %13 = vector.load %arg8[%c0_11, %c0_12] : memref<16x128xf32, #tpu.memory_space<vmem>>, vector<16x128xf32>
      tpu.vector_store %arg8[%c0_11, %c0_12], %12 {strides = array<i32>} : memref<16x128xf32, #tpu.memory_space<vmem>>, vector<16x128xf32>,
    } else {
    }
    %c0 = arith.constant 0 : index
    %c0_1 = arith.constant 0 : index
    %3 = vector.load %arg8[%c0, %c0_1] : memref<16x128xf32, #tpu.memory_space<vmem>>, vector<16x128xf32>
    %c0_2 = arith.constant 0 : index
    %c0_3 = arith.constant 0 : index
    %4 = vector.load %arg3[%c0_2, %c0_3] : memref<16x256xf32, #tpu.memory_space<vmem>>, vector<16x256xf32>
    %c0_4 = arith.constant 0 : index
    %c0_5 = arith.constant 0 : index
    %5 = vector.load %arg4[%c0_4, %c0_5] : memref<256x128xf32, #tpu.memory_space<vmem>>, vector<256x128xf32>
    %cst = arith.constant dense<0.000000e+00> : vector<16x128xf32>
    %6 = tpu.matmul %4, %5, %cst {dimension_numbers = #tpu.dot_dimension_numbers<[1], [0], [0], [1], [0, 0, 1, 1], [], []>} : vector<16x256xf32>, vector<256x128xf32>, vector<16x128xf32> -> vector<16x128xf32>
    %7 = arith.addf %3, %6 : vector<16x128xf32>
    %c0_6 = arith.constant 0 : index
    %c0_7 = arith.constant 0 : index
    %8 = vector.load %arg8[%c0_6, %c0_7] : memref<16x128xf32, #tpu.memory_space<vmem>>, vector<16x128xf32>
    tpu.vector_store %arg8[%c0_6, %c0_7], %7 {strides = array<i32>} : memref<16x128xf32, #tpu.memory_space<vmem>>, vector<16x128xf32>,
    %c0_i32_8 = arith.constant 0 : i32
    %9 = arith.cmpi eq, %arg2, %c0_i32_8 : i32
    %10 = arith.extui %9 : i1 to i32
    %c0_i32_9 = arith.constant 0 : i32
    %11 = arith.cmpi ne, %10, %c0_i32_9 : i32
    scf.if %11 {
      %c0_10 = arith.constant 0 : index
      %c0_11 = arith.constant 0 : index
      %12 = vector.load %arg8[%c0_10, %c0_11] : memref<16x128xf32, #tpu.memory_space<vmem>>, vector<16x128xf32>
      %c0_12 = arith.constant 0 : index
      %c0_13 = arith.constant 0 : index
      %13 = vector.load %arg5[%c0_12, %c0_13] : memref<1x128xf32, #tpu.memory_space<vmem>>, vector<1x128xf32>
      %14 = vector.broadcast %13 : vector<1x128xf32> to vector<16x128xf32>
      %15 = arith.addf %12, %14 : vector<16x128xf32>
      %c0_14 = arith.constant 0 : index
      %c0_15 = arith.constant 0 : index
      %16 = vector.load %arg6[%c0_14, %c0_15] : memref<16x128xf32, #tpu.memory_space<vmem>>, vector<16x128xf32>
      %17 = arith.addf %15, %16 : vector<16x128xf32>
      %c0_16 = arith.constant 0 : index
      %c0_17 = arith.constant 0 : index
      %18 = vector.load %arg7[%c0_16, %c0_17] : memref<16x128xf32, #tpu.memory_space<vmem>>, vector<16x128xf32>
      tpu.vector_store %arg7[%c0_16, %c0_17], %17 {strides = array<i32>} : memref<16x128xf32, #tpu.memory_space<vmem>>, vector<16x128xf32>,
    } else {
    }
    return
  }
  func.func @transform_0(%arg0: i32, %arg1: i32, %arg2: i32) -> (i32, i32) {
    %c0_i32 = arith.constant 0 : i32
    return %arg0, %arg2 : i32, i32
  }
  func.func @transform_1(%arg0: i32, %arg1: i32, %arg2: i32) -> (i32, i32) {
    %c0_i32 = arith.constant 0 : i32
    return %arg2, %arg1 : i32, i32
  }
  func.func @transform_2(%arg0: i32, %arg1: i32, %arg2: i32) -> (i32, i32) {
    %c0_i32 = arith.constant 0 : i32
    %c0_i32_0 = arith.constant 0 : i32
    return %c0_i32, %arg1 : i32, i32
  }
  func.func @transform_3(%arg0: i32, %arg1: i32, %arg2: i32) -> (i32, i32) {
    %c0_i32 = arith.constant 0 : i32
    return %arg0, %arg1 : i32, i32
  }
  func.func @transform_4(%arg0: i32, %arg1: i32, %arg2: i32) -> (i32, i32) {
    %c0_i32 = arith.constant 0 : i32
    return %arg0, %arg1 : i32, i32
  }
}

</mosaic_0001>

<bundles_post_ra>
// kernel: sconv_block_forward.7
= control target key start
LH: loop header
LB: loop body
LE: loop exit
PB: predicated region body
PF: predicated region fallthrough
CT: control target
= control target key end

     0   :  { %s77_s0 = inlined_call_operand.vmem [shape: f32[16,128], index: 0, kind: input, shape index: {}]   ;;  %s78_s1 = inlined_call_operand.vmem [shape: f32[1,128], index: 1, kind: input, shape index: {}]   ;;  %s79_s2 = inlined_call_operand.vmem [shape: f32[16,128], index: 2, kind: output, shape index: {}]  }
   0x1   :  { %v11_v0 = vld [vmem:[%s77_s0] sm:$0xff]  ;;  %v12_v1 = vld [vmem:[%s77_s0 + $0x8] sm:$0xff] }
   0x2   :  { %v13_v2 = vmul.f32 %v11_v0, %v11_v0  ;;  %v14_v3 = vmul.f32 %v12_v1, %v12_v1  ;;  %v42_v11 = vld [vmem:[%s78_s1] ss:$0 sm:$0xff] }
   0x4   :  { %15 = vadd.xlane.f32.xlu0 %v13_v2 }
   0x8   :  { %17 = vadd.xlane.f32.xlu0 %v14_v3 }
  0x8d   :  { %v16_v4 = vpop.xlane.xlu0 %15 }
  0x8e   :  { %v19_v5 = vmul.f32 0.0078125, %v16_v4 }
  0x90   :  { %v21_v6 = vadd.f32 1e-06, %v19_v5 }
  0x91   :  { %v18_v7 = vpop.xlane.xlu0 %17 }
  0x92   :  { %43 = vrsqrt.f32 %v21_v6  ;;  %v20_v8 = vmul.f32 0.0078125, %v18_v7 }
  0x94   :  { %v22_v9 = vadd.f32 1e-06, %v20_v8 }
  0x96   :  { %45 = vrsqrt.f32 %v22_v9 }
  0x9f   :  { %v44_v10 = vpop.eup %43 }
  0xa0   :  { %v25_v12 = vmul.f32 %v44_v10, %v11_v0 }
  0xa2   :  { %v34_v13 = vmul.f32 %v42_v11, %v25_v12 }
  0xa3   :  { %v46_v14 = vpop.eup %45 }
  0xa4   :  { %36 = vst [vmem:[%s79_s2] sm:$0xff] %v34_v13  ;;  %v26_v15 = vmul.f32 %v46_v14, %v12_v1 }
  0xa6   :  { %v35_v16 = vmul.f32 %v42_v11, %v26_v15 }
  0xa8   :  { %37 = vst [vmem:[%s79_s2 + $0x8] sm:$0xff] %v35_v16 }

// kernel: sconv_block_forward.8
= control target key start
LH: loop header
LB: loop body
LE: loop exit
PB: predicated region body
PF: predicated region fallthrough
CT: control target
= control target key end

     0   :  { %s537_s3 = inlined_call_operand.vmem [shape: f32[128,128], index: 3, kind: input, shape index: {}]   ;;  %s538_s0 = inlined_call_operand.vmem [shape: f32[16,128], index: 0, kind: input, shape index: {}]   ;;  %s539_s1 = inlined_call_operand.vmem [shape: f32[128,128], index: 1, kind: input, shape index: {}]   ;;  %s540_s4 = inlined_call_operand.vmem [shape: f32[1,128], index: 4, kind: input, shape index: {}]   ;;  %s541_s2 = inlined_call_operand.vmem [shape: f32[1,128], index: 2, kind: input, shape index: {}]   ;;  %s542_s5 = inlined_call_operand.vmem [shape: f32[16,128], index: 5, kind: output, shape index: {}]  }
   0x1   :  { %v144_v0 = vld [vmem:[%s537_s3 + $0x78] sm:$0xff]  ;;  %v143_v1 = vld [vmem:[%s537_s3 + $0x70] sm:$0xff]  ;;  %v142_v2 = vld [vmem:[%s537_s3 + $0x68] sm:$0xff] }
   0x2   :  { %346 = vmatprep.subr.mxu1 %v144_v0  ;;  %v141_v3 = vld [vmem:[%s537_s3 + $0x60] sm:$0xff]  ;;  %v47_v5 = vld [vmem:[%s539_s1 + $0x78] sm:$0xff]  ;;  %v46_v7 = vld [vmem:[%s539_s1 + $0x70] sm:$0xff] }
   0x3   :  { %347 = vmatpush3.msra.mxu1 %v144_v0  ;;  %v434_v4 = vld [vmem:[%s538_s0] sm:$0xff]  ;;  %v140_v6 = vld [vmem:[%s537_s3 + $0x58] sm:$0xff]  ;;  %311 = vmatprep.subr.mxu0 %v47_v5  ;;  %v139_v8 = vld [vmem:[%s537_s3 + $0x50] sm:$0xff] }
   0x4   :  { %348 = vmatprep.subr.mxu1 %v143_v1  ;;  %378 = vmatprep.mubr.f32.mxu1 %v434_v4  ;;  %v45_v9 = vld [vmem:[%s539_s1 + $0x68] sm:$0xff]  ;;  %v44_v11 = vld [vmem:[%s539_s1 + $0x60] sm:$0xff]  ;;  %v43_v13 = vld [vmem:[%s539_s1 + $0x58] sm:$0xff] }
   0x5   :  { %349 = vmatpush3.msra.mxu1 %v143_v1  ;;  %312 = vmatpush3.msra.mxu0 %v47_v5  ;;  %v138_v10 = vld [vmem:[%s537_s3 + $0x48] sm:$0xff]  ;;  %v137_v12 = vld [vmem:[%s537_s3 + $0x40] sm:$0xff]  ;;  %v136_v14 = vld [vmem:[%s537_s3 + $0x38] sm:$0xff] }
   0x6   :  { %350 = vmatprep.subr.mxu1 %v142_v2  ;;  %313 = vmatprep.subr.mxu0 %v46_v7  ;;  %v42_v15 = vld [vmem:[%s539_s1 + $0x50] sm:$0xff]  ;;  %v41_v17 = vld [vmem:[%s539_s1 + $0x48] sm:$0xff]  ;;  %v40_v19 = vld [vmem:[%s539_s1 + $0x40] sm:$0xff] }
   0x7   :  { %351 = vmatpush3.msra.mxu1 %v142_v2  ;;  %314 = vmatpush3.msra.mxu0 %v46_v7  ;;  %v135_v16 = vld [vmem:[%s537_s3 + $0x30] sm:$0xff]  ;;  %v134_v18 = vld [vmem:[%s537_s3 + $0x28] sm:$0xff]  ;;  %v133_v20 = vld [vmem:[%s537_s3 + $0x20] sm:$0xff] }
   0x8   :  { %352 = vmatprep.subr.mxu1 %v141_v3  ;;  %315 = vmatprep.subr.mxu0 %v45_v9  ;;  %v39_v21 = vld [vmem:[%s539_s1 + $0x38] sm:$0xff]  ;;  %v38_v23 = vld [vmem:[%s539_s1 + $0x30] sm:$0xff]  ;;  %v37_v25 = vld [vmem:[%s539_s1 + $0x28] sm:$0xff] }
   0x9   :  { %353 = vmatpush3.msra.mxu1 %v141_v3  ;;  %316 = vmatpush3.msra.mxu0 %v45_v9  ;;  %v132_v22 = vld [vmem:[%s537_s3 + $0x18] sm:$0xff]  ;;  %v131_v24 = vld [vmem:[%s537_s3 + $0x10] sm:$0xff]  ;;  %v130_v26 = vld [vmem:[%s537_s3 + $0x8] sm:$0xff] }
   0xa   :  { %354 = vmatprep.subr.mxu1 %v140_v6  ;;  %317 = vmatprep.subr.mxu0 %v44_v11  ;;  %v36_v27 = vld [vmem:[%s539_s1 + $0x20] sm:$0xff]  ;;  %v35_v29 = vld [vmem:[%s539_s1 + $0x18] sm:$0xff]  ;;  %v29_v30 = vld [vmem:[%s538_s0 + $0x8] sm:$0xff] }
   0xb   :  { %355 = vmatpush3.msra.mxu1 %v140_v6  ;;  %318 = vmatpush3.msra.mxu0 %v44_v11  ;;  %v129_v28 = vld [vmem:[%s537_s3] sm:$0xff]  ;;  %v34_v31 = vld [vmem:[%s539_s1 + $0x10] sm:$0xff]  ;;  %v33_v32 = vld [vmem:[%s539_s1 + $0x8] sm:$0xff] }
   0xc   :  { %356 = vmatprep.subr.mxu1 %v139_v8  ;;  %319 = vmatprep.subr.mxu0 %v43_v13  ;;  %v32_v33 = vld [vmem:[%s539_s1] sm:$0xff] }
   0xd   :  { %357 = vmatpush3.msra.mxu1 %v139_v8  ;;  %320 = vmatpush3.msra.mxu0 %v43_v13  ;;  %v272_v34 = vld [vmem:[%s540_s4] ss:$0 sm:$0xff] }
   0xe   :  { %358 = vmatprep.subr.mxu1 %v138_v10  ;;  %321 = vmatprep.subr.mxu0 %v42_v15  ;;  %v271_v46 = vld [vmem:[%s541_s2] ss:$0 sm:$0xff] }
   0xf   :  { %359 = vmatpush3.msra.mxu1 %v138_v10  ;;  %322 = vmatpush3.msra.mxu0 %v42_v15 }
  0x10   :  { %360 = vmatprep.subr.mxu1 %v137_v12  ;;  %323 = vmatprep.subr.mxu0 %v41_v17 }
  0x11   :  { %361 = vmatpush3.msra.mxu1 %v137_v12  ;;  %324 = vmatpush3.msra.mxu0 %v41_v17 }
  0x12   :  { %362 = vmatprep.subr.mxu1 %v136_v14  ;;  %325 = vmatprep.subr.mxu0 %v40_v19 }
  0x13   :  { %363 = vmatpush3.msra.mxu1 %v136_v14  ;;  %326 = vmatpush3.msra.mxu0 %v40_v19 }
  0x14   :  { %364 = vmatprep.subr.mxu1 %v135_v16  ;;  %327 = vmatprep.subr.mxu0 %v39_v21 }
  0x15   :  { %365 = vmatpush3.msra.mxu1 %v135_v16  ;;  %328 = vmatpush3.msra.mxu0 %v39_v21 }
  0x16   :  { %366 = vmatprep.subr.mxu1 %v134_v18  ;;  %329 = vmatprep.subr.mxu0 %v38_v23 }
  0x17   :  { %367 = vmatpush3.msra.mxu1 %v134_v18  ;;  %330 = vmatpush3.msra.mxu0 %v38_v23 }
  0x18   :  { %368 = vmatprep.subr.mxu1 %v133_v20  ;;  %331 = vmatprep.subr.mxu0 %v37_v25 }
  0x19   :  { %369 = vmatpush3.msra.mxu1 %v133_v20  ;;  %332 = vmatpush3.msra.mxu0 %v37_v25 }
  0x1a   :  { %370 = vmatprep.subr.mxu1 %v132_v22  ;;  %333 = vmatprep.subr.mxu0 %v36_v27 }
  0x1b   :  { %371 = vmatpush3.msra.mxu1 %v132_v22  ;;  %334 = vmatpush3.msra.mxu0 %v36_v27 }
  0x1c   :  { %372 = vmatprep.subr.mxu1 %v131_v24  ;;  %335 = vmatprep.subr.mxu0 %v35_v29 }
  0x1d   :  { %373 = vmatpush3.msra.mxu1 %v131_v24  ;;  %336 = vmatpush3.msra.mxu0 %v35_v29 }
  0x1e   :  { %374 = vmatprep.subr.mxu1 %v130_v26  ;;  %337 = vmatprep.subr.mxu0 %v34_v31 }
  0x1f   :  { %375 = vmatpush3.msra.mxu1 %v130_v26  ;;  %338 = vmatpush3.msra.mxu0 %v34_v31 }
  0x20   :  { %376 = vmatprep.subr.mxu1 %v129_v28  ;;  %343 = vmatprep.mubr.f32.mxu0 %v434_v4 }
  0x21   :  { %377 = vmatpush3.msra.mxu1 %v129_v28  ;;  %339 = vmatprep.subr.mxu0 %v33_v32 }
  0x22   :  { %379 = vmatmul.mubr.f32.vlgmr.msra.gmra.mxu1 %v29_v30  ;;  %340 = vmatpush3.msra.mxu0 %v33_v32 }
  0x23   :  { %341 = vmatprep.subr.mxu0 %v32_v33 }
  0x24   :  { %342 = vmatpush3.msra.mxu0 %v32_v33 }
  0x25   :  { %344 = vmatmul.mubr.f32.vlgmr.msra.gmra.mxu0 %v29_v30 }
  0xe2   :  { %v380_v35 = vpop.f32.mrf.mxu1 }
  0xe3   :  { %v248_v36 = vadd.f32 %v380_v35, %v272_v34 }
  0xe4   :  { %v211_v37 = vpop.f32.mrf.mxu1 }
  0xe5   :  { %v274_v38 = vmul.f32 -1.442695, %v248_v36  ;;  %v247_v39 = vadd.f32 %v272_v34, %v211_v37  ;;  %v345_v45 = vpop.f32.mrf.mxu0 }
  0xe6   :  { %v237_v47 = vadd.f32 %v345_v45, %v271_v46 }
  0xe7   :  { %381 = vpow2.f32 %v274_v38  ;;  %v273_v40 = vmul.f32 -1.442695, %v247_v39  ;;  %v114_v49 = vpop.f32.mrf.mxu0 }
  0xe8   :  { %v236_v54 = vadd.f32 %v271_v46, %v114_v49 }
  0xe9   :  { %383 = vpow2.f32 %v273_v40 }
  0xf4   :  { %v382_v41 = vpop.eup %381 }
  0xf5   :  { %v256_v42 = vadd.f32 1.0, %v382_v41 }
  0xf6   :  { %v384_v43 = vpop.eup %383 }
  0xf7   :  { %385 = vrcp.f32 %v256_v42  ;;  %v255_v44 = vadd.f32 1.0, %v384_v43 }
  0xf9   :  { %387 = vrcp.f32 %v255_v44 }
 0x104   :  { %v386_v48 = vpop.eup %385 }
 0x105   :  { %v262_v50 = vmul.f32 %v386_v48, %v248_v36 }
 0x106   :  { %v388_v51 = vpop.eup %387 }
 0x107   :  { %v261_v52 = vmul.f32 %v388_v51, %v247_v39  ;;  %v264_v53 = vmul.f32 %v262_v50, %v237_v47 }
 0x109   :  { %266 = vst [vmem:[%s542_s5 + $0x8] sm:$0xff] %v264_v53  ;;  %v263_v55 = vmul.f32 %v261_v52, %v236_v54 }
 0x10b   :  { %265 = vst [vmem:[%s542_s5] sm:$0xff] %v263_v55 }

// kernel: custom-call
= control target key start
LH: loop header
LB: loop body
LE: loop exit
PB: predicated region body
PF: predicated region fallthrough
CT: control target
= control target key end

     0   :  { %2 = vsyncpa [#allocation0], 0  ;;  %s47_s0 = inlined_call_operand.hbm [shape: c64[128], index: 0, kind: input, shape index: {}]   ;;  %s48_s1 = inlined_call_operand.vmem [shape: f32[128], index: 1, kind: output, shape index: {}]  }
   0x1   :  { %s3_s8 = sshll.u32 %s48_s1, 4  ;;  %s4_s8 = int_to_ptr.vmem [resolvable:$true] %s3_s8 }
   0x2   :  { %s17_s9 = scalar_lea.vmem %s4_s8, 16  ;;  %p22_p1 = scmp.lt.s32.totalorder %s4_s8, %s4_s8 }
   0x3   :  { %p18_p0 = scmp.ne.s32.totalorder %s4_s8, %s17_s9  ;;  %p23_p2 = scmp.lt.s32.totalorder %s17_s9, %s17_s9 }
   0x5   :  { %p24_p3 = por %p23_p2, %p22_p1 }
   0x7   :  { %p25_p4 = pnand %p24_p3, %p18_p0 }
   0x9   :  { %28 = shalt.err (!%p25_p4)  }
   0xa   :  { %6 = dma.hbm_to_vmem [thread:$0]  %s47_s0, 16, %s4_s8, [#allocation0] }
   0xb   :  { %29 = dma.done.wait [#allocation0], 16  }
   0xc   :  { %30 = vsyncadd [#allocation0], 4294967280 }
   0xd   :  { %8 = vsyncpa [#allocation0], 1 }

// kernel: custom-call.1
= control target key start
LH: loop header
LB: loop body
LE: loop exit
PB: predicated region body
PF: predicated region fallthrough
CT: control target
= control target key end

     0   :  { %s51_s0 = inlined_call_operand.hbm [shape: c64[128], index: 0, kind: input, shape index: {}]   ;;  %s52_s1 = inlined_call_operand.vmem [shape: f32[128], index: 1, kind: output, shape index: {}]  }
   0x1   :  { %s2_s8 = scalar_lea.hbm %s51_s0, 16 }
   0x2   :  { %3 = vsyncpa [#allocation0], 0  ;;  %s4_s11 = sshll.u32 %s52_s1, 4  ;;  %s5_s11 = int_to_ptr.vmem [resolvable:$true] %s4_s11 }
   0x3   :  { %s20_s12 = scalar_lea.vmem %s5_s11, 16  ;;  %p25_p1 = scmp.lt.s32.totalorder %s5_s11, %s5_s11 }
   0x4   :  { %p21_p0 = scmp.ne.s32.totalorder %s5_s11, %s20_s12  ;;  %p26_p2 = scmp.lt.s32.totalorder %s20_s12, %s20_s12 }
   0x6   :  { %p27_p3 = por %p26_p2, %p25_p1 }
   0x8   :  { %p28_p4 = pnand %p27_p3, %p21_p0 }
   0xa   :  { %31 = shalt.err (!%p28_p4)  }
   0xb   :  { %7 = dma.hbm_to_vmem [thread:$0]  %s2_s8, 16, %s5_s11, [#allocation0] }
   0xc   :  { %33 = dma.done.wait [#allocation0], 16  }
   0xd   :  { %34 = vsyncadd [#allocation0], 4294967280 }
   0xe   :  { %9 = vsyncpa [#allocation0], 1 }

// kernel: sconv_block_forward.13
= control target key start
LH: loop header
LB: loop body
LE: loop exit
PB: predicated region body
PF: predicated region fallthrough
CT: control target
= control target key end

     0   :  { %s421_s0 = inlined_call_operand.vmem [shape: f32[16,256], index: 0, kind: input, shape index: {}]   ;;  %s422_s1 = inlined_call_operand.vmem [shape: f32[256,128], index: 1, kind: input, shape index: {}]   ;;  %s423_s2 = inlined_call_operand.vmem [shape: f32[1,128], index: 2, kind: input, shape index: {}]   ;;  %s424_s3 = inlined_call_operand.vmem [shape: f32[16,128], index: 3, kind: input, shape index: {}]   ;;  %s425_s4 = inlined_call_operand.hbm [shape: f32[16,128], index: 4, kind: output, shape index: {}]  }
   0x1   :  { %v61_v0 = vld [vmem:[%s422_s1 + $0xf8] sm:$0xff]  ;;  %v60_v2 = vld [vmem:[%s422_s1 + $0xf0] sm:$0xff]  ;;  %v59_v4 = vld [vmem:[%s422_s1 + $0xe8] sm:$0xff] }
   0x2   :  { %v45_v1 = vld [vmem:[%s422_s1 + $0x78] sm:$0xff]  ;;  %178 = vmatprep.subr.mxu0 %v61_v0  ;;  %216 = vmatprep.subr.mxu1 %v61_v0  ;;  %v44_v3 = vld [vmem:[%s422_s1 + $0x70] sm:$0xff]  ;;  %v43_v5 = vld [vmem:[%s422_s1 + $0x68] sm:$0xff] }
   0x3   :  { %179 = vmatpush3.msra.mxu0 %v45_v1  ;;  %232 = vmatpush3.msra.mxu1 %v45_v1  ;;  %v58_v6 = vld [vmem:[%s422_s1 + $0xe0] sm:$0xff]  ;;  %v57_v8 = vld [vmem:[%s422_s1 + $0xd8] sm:$0xff]  ;;  %v56_v10 = vld [vmem:[%s422_s1 + $0xd0] sm:$0xff] }
   0x4   :  { %180 = vmatprep.subr.mxu0 %v60_v2  ;;  %217 = vmatprep.subr.mxu1 %v60_v2  ;;  %v42_v7 = vld [vmem:[%s422_s1 + $0x60] sm:$0xff]  ;;  %v41_v9 = vld [vmem:[%s422_s1 + $0x58] sm:$0xff]  ;;  %v40_v11 = vld [vmem:[%s422_s1 + $0x50] sm:$0xff] }
   0x5   :  { %181 = vmatpush3.msra.mxu0 %v44_v3  ;;  %233 = vmatpush3.msra.mxu1 %v44_v3  ;;  %v55_v12 = vld [vmem:[%s422_s1 + $0xc8] sm:$0xff]  ;;  %v54_v14 = vld [vmem:[%s422_s1 + $0xc0] sm:$0xff] }
   0x6   :  { %182 = vmatprep.subr.mxu0 %v59_v4  ;;  %218 = vmatprep.subr.mxu1 %v59_v4  ;;  %v39_v13 = vld [vmem:[%s422_s1 + $0x48] sm:$0xff] }
   0x7   :  { %183 = vmatpush3.msra.mxu0 %v43_v5  ;;  %234 = vmatpush3.msra.mxu1 %v43_v5 }
   0x8   :  { %184 = vmatprep.subr.mxu0 %v58_v6  ;;  %219 = vmatprep.subr.mxu1 %v58_v6 }
   0x9   :  { %185 = vmatpush3.msra.mxu0 %v42_v7  ;;  %235 = vmatpush3.msra.mxu1 %v42_v7 }
   0xa   :  { %186 = vmatprep.subr.mxu0 %v57_v8  ;;  %220 = vmatprep.subr.mxu1 %v57_v8 }
   0xb   :  { %187 = vmatpush3.msra.mxu0 %v41_v9  ;;  %236 = vmatpush3.msra.mxu1 %v41_v9 }
   0xc   :  { %188 = vmatprep.subr.mxu0 %v56_v10  ;;  %221 = vmatprep.subr.mxu1 %v56_v10 }
   0xd   :  { %189 = vmatpush3.msra.mxu0 %v40_v11  ;;  %237 = vmatpush3.msra.mxu1 %v40_v11 }
   0xe   :  { %9 = vsyncpa [#allocation4], 0  ;;  %190 = vmatprep.subr.mxu0 %v55_v12  ;;  %222 = vmatprep.subr.mxu1 %v55_v12  ;;  %v38_v15 = vld [vmem:[%s422_s1 + $0x40] sm:$0xff]  ;;  %v53_v16 = vld [vmem:[%s422_s1 + $0xb8] sm:$0xff]  ;;  %s273_s10 = smov [#allocation3]  }
   0xf   :  { %191 = vmatpush3.msra.mxu0 %v39_v13  ;;  %238 = vmatpush3.msra.mxu1 %v39_v13  ;;  %v37_v17 = vld [vmem:[%s422_s1 + $0x38] sm:$0xff]  ;;  %v52_v18 = vld [vmem:[%s422_s1 + $0xb0] sm:$0xff]  ;;  %v51_v20 = vld [vmem:[%s422_s1 + $0xa8] sm:$0xff]  ;;  %s166_s11 = sshll.u32 %s273_s10, 4  ;;  %s167_s11 = int_to_ptr.vmem [resolvable:$true] %s166_s11 }
  0x10   :  { %192 = vmatprep.subr.mxu0 %v54_v14  ;;  %223 = vmatprep.subr.mxu1 %v54_v14  ;;  %v36_v19 = vld [vmem:[%s422_s1 + $0x30] sm:$0xff]  ;;  %v35_v21 = vld [vmem:[%s422_s1 + $0x28] sm:$0xff]  ;;  %v50_v22 = vld [vmem:[%s422_s1 + $0xa0] sm:$0xff]  ;;  %p256_p1 = scmp.lt.s32.totalorder %s167_s11, %s167_s11 }
  0x11   :  { %193 = vmatpush3.msra.mxu0 %v38_v15  ;;  %239 = vmatpush3.msra.mxu1 %v38_v15  ;;  %v34_v23 = vld [vmem:[%s422_s1 + $0x20] sm:$0xff]  ;;  %v49_v24 = vld [vmem:[%s422_s1 + $0x98] sm:$0xff]  ;;  %v48_v26 = vld [vmem:[%s422_s1 + $0x90] sm:$0xff] }
  0x12   :  { %194 = vmatprep.subr.mxu0 %v53_v16  ;;  %224 = vmatprep.subr.mxu1 %v53_v16  ;;  %v33_v25 = vld [vmem:[%s422_s1 + $0x18] sm:$0xff]  ;;  %v32_v27 = vld [vmem:[%s422_s1 + $0x10] sm:$0xff]  ;;  %v47_v28 = vld [vmem:[%s422_s1 + $0x88] sm:$0xff] }
  0x13   :  { %195 = vmatpush3.msra.mxu0 %v37_v17  ;;  %240 = vmatpush3.msra.mxu1 %v37_v17  ;;  %v31_v29 = vld [vmem:[%s422_s1 + $0x8] sm:$0xff]  ;;  %v46_v30 = vld [vmem:[%s422_s1 + $0x80] sm:$0xff]  ;;  %v29_v33 = vld [vmem:[%s421_s0 + $0x18] sm:$0xff] }
  0x14   :  { %196 = vmatprep.subr.mxu0 %v52_v18  ;;  %225 = vmatprep.subr.mxu1 %v52_v18  ;;  %v30_v31 = vld [vmem:[%s422_s1] sm:$0xff]  ;;  %v27_v32 = vld [vmem:[%s421_s0 + $0x8] sm:$0xff]  ;;  %v28_v35 = vld [vmem:[%s421_s0 + $0x10] sm:$0xff] }
  0x15   :  { %197 = vmatpush3.msra.mxu0 %v36_v19  ;;  %241 = vmatpush3.msra.mxu1 %v36_v19  ;;  %v26_v34 = vld [vmem:[%s421_s0] sm:$0xff]  ;;  %v156_v44 = vld [vmem:[%s424_s3 + $0x8] sm:$0xff] }
  0x16   :  { %198 = vmatprep.subr.mxu0 %v51_v20  ;;  %226 = vmatprep.subr.mxu1 %v51_v20  ;;  %v177_v39 = vld [vmem:[%s423_s2] ss:$0 sm:$0xff]  ;;  %s251_s2 = scalar_lea.vmem %s167_s11, 256 }
  0x17   :  { %199 = vmatpush3.msra.mxu0 %v35_v21  ;;  %242 = vmatpush3.msra.mxu1 %v35_v21  ;;  %v155_v43 = vld [vmem:[%s424_s3] sm:$0xff]  ;;  %p252_p0 = scmp.ne.s32.totalorder %s167_s11, %s251_s2  ;;  %p257_p2 = scmp.lt.s32.totalorder %s251_s2, %s251_s2 }
  0x18   :  { %200 = vmatprep.subr.mxu0 %v50_v22  ;;  %227 = vmatprep.subr.mxu1 %v50_v22 }
  0x19   :  { %201 = vmatpush3.msra.mxu0 %v34_v23  ;;  %243 = vmatpush3.msra.mxu1 %v34_v23  ;;  %p258_p3 = por %p257_p2, %p256_p1 }
  0x1a   :  { %202 = vmatprep.subr.mxu0 %v49_v24  ;;  %228 = vmatprep.subr.mxu1 %v49_v24 }
  0x1b   :  { %203 = vmatpush3.msra.mxu0 %v33_v25  ;;  %244 = vmatpush3.msra.mxu1 %v33_v25  ;;  %p259_p4 = pnand %p258_p3, %p252_p0 }
  0x1c   :  { %204 = vmatprep.subr.mxu0 %v48_v26  ;;  %229 = vmatprep.subr.mxu1 %v48_v26 }
  0x1d   :  { %205 = vmatpush3.msra.mxu0 %v32_v27  ;;  %245 = vmatpush3.msra.mxu1 %v32_v27 }
  0x1e   :  { %206 = vmatprep.subr.mxu0 %v47_v28  ;;  %230 = vmatprep.subr.mxu1 %v47_v28 }
  0x1f   :  { %207 = vmatpush3.msra.mxu0 %v31_v29  ;;  %246 = vmatpush3.msra.mxu1 %v31_v29 }
  0x20   :  { %208 = vmatprep.subr.mxu0 %v46_v30  ;;  %231 = vmatprep.subr.mxu1 %v46_v30 }
  0x21   :  { %209 = vmatpush3.msra.mxu0 %v30_v31  ;;  %247 = vmatpush3.msra.mxu1 %v30_v31 }
  0x22   :  { %126 = vmatprep.mubr.f32.mxu0 %v27_v32  ;;  %131 = vmatprep.mubr.f32.mxu1 %v29_v33 }
  0x23   :  { %127 = vmatmul.mubr.f32.vlgmr.msra.gmra.mxu0 %v26_v34  ;;  %132 = vmatmul.mubr.f32.vlgmr.msra.gmra.mxu1 %v28_v35 }
  0xe3   :  { %v210_v36 = vpop.f32.mrf.mxu0  ;;  %v213_v37 = vpop.f32.mrf.mxu1 }
  0xe5   :  { %v211_v38 = vpop.f32.mrf.mxu0  ;;  %v214_v40 = vpop.f32.mrf.mxu1 }
  0xe6   :  { %v212_v41 = vadd.f32 %v211_v38, %v210_v36  ;;  %v215_v42 = vadd.f32 %v214_v40, %v213_v37 }
  0xe8   :  { %v153_v45 = vadd.f32 %v212_v41, %v177_v39  ;;  %v154_v46 = vadd.f32 %v215_v42, %v177_v39 }
  0xea   :  { %v157_v47 = vadd.f32 %v155_v43, %v153_v45  ;;  %v158_v48 = vadd.f32 %v156_v44, %v154_v46 }
  0xec   :  { %159 = vst [vmem:[#allocation3] sm:$0xff] %v157_v47  ;;  %160 = vst [vmem:[#allocation3 + $0x8] sm:$0xff] %v158_v48 }
  0xed   :  { %262 = shalt.err (!%p259_p4)
}
  0xee   :  { %s274_s15 = smov 128   ;;  %s275_s16 = smov 8  }
  0xef   :  { %172 = dma.vmem_to_hbm [thread:$0]  %s167_s11, 256, %s425_s4, [#allocation4], %s274_s15, %s274_s15, %s275_s16  }
  0xf0   :  { %271 = dma.done.wait [#allocation4], 256  }
  0xf1   :  { %272 = vsyncadd [#allocation4], 4294967040 }
  0xf2   :  { %176 = vsyncpa [#allocation4], 1 }

// kernel: sconv_block_forward.10
= control target key start
LH: loop header
LB: loop body
LE: loop exit
PB: predicated region body
PF: predicated region fallthrough
CT: control target
= control target key end

     0   :  { %s567_s4 = inlined_call_operand.vmem [shape: f32[128,128], index: 4, kind: input, shape index: {}]   ;;  %s568_s1 = inlined_call_operand.vmem [shape: f32[16,128], index: 1, kind: input, shape index: {}]   ;;  %s569_s2 = inlined_call_operand.vmem [shape: f32[128,128], index: 2, kind: input, shape index: {}]   ;;  %s570_s0 = inlined_call_operand.vmem [shape: f32[16,128], index: 0, kind: input, shape index: {}]   ;;  %s571_s5 = inlined_call_operand.vmem [shape: f32[1,128], index: 5, kind: input, shape index: {}]   ;;  %s572_s3 = inlined_call_operand.vmem [shape: f32[1,128], index: 3, kind: input, shape index: {}]   ;;  %s573_s6 = inlined_call_operand.vmem [shape: f32[16,128], index: 6, kind: input, shape index: {}]   ;;  %s574_s7 = inlined_call_operand.vmem [shape: f32[16,128], index: 7, kind: output, shape index: {}]  }
   0x1   :  { %v152_v0 = vld [vmem:[%s567_s4 + $0x78] sm:$0xff]  ;;  %v151_v1 = vld [vmem:[%s567_s4 + $0x70] sm:$0xff]  ;;  %v150_v2 = vld [vmem:[%s567_s4 + $0x68] sm:$0xff] }
   0x2   :  { %358 = vmatprep.subr.mxu1 %v152_v0  ;;  %v149_v3 = vld [vmem:[%s567_s4 + $0x60] sm:$0xff]  ;;  %v53_v5 = vld [vmem:[%s569_s2 + $0x78] sm:$0xff]  ;;  %v52_v7 = vld [vmem:[%s569_s2 + $0x70] sm:$0xff] }
   0x3   :  { %359 = vmatpush3.msra.mxu1 %v152_v0  ;;  %v135_v4 = vld [vmem:[%s568_s1] sm:$0xff]  ;;  %v148_v6 = vld [vmem:[%s567_s4 + $0x58] sm:$0xff]  ;;  %323 = vmatprep.subr.mxu0 %v53_v5  ;;  %v147_v8 = vld [vmem:[%s567_s4 + $0x50] sm:$0xff] }
   0x4   :  { %360 = vmatprep.subr.mxu1 %v151_v1  ;;  %390 = vmatprep.mubr.f32.mxu1 %v135_v4  ;;  %v51_v9 = vld [vmem:[%s569_s2 + $0x68] sm:$0xff]  ;;  %v50_v11 = vld [vmem:[%s569_s2 + $0x60] sm:$0xff]  ;;  %v49_v13 = vld [vmem:[%s569_s2 + $0x58] sm:$0xff] }
   0x5   :  { %361 = vmatpush3.msra.mxu1 %v151_v1  ;;  %324 = vmatpush3.msra.mxu0 %v53_v5  ;;  %v146_v10 = vld [vmem:[%s567_s4 + $0x48] sm:$0xff]  ;;  %v145_v12 = vld [vmem:[%s567_s4 + $0x40] sm:$0xff]  ;;  %v144_v14 = vld [vmem:[%s567_s4 + $0x38] sm:$0xff] }
   0x6   :  { %362 = vmatprep.subr.mxu1 %v150_v2  ;;  %325 = vmatprep.subr.mxu0 %v52_v7  ;;  %v48_v15 = vld [vmem:[%s569_s2 + $0x50] sm:$0xff]  ;;  %v47_v17 = vld [vmem:[%s569_s2 + $0x48] sm:$0xff]  ;;  %v46_v19 = vld [vmem:[%s569_s2 + $0x40] sm:$0xff] }
   0x7   :  { %363 = vmatpush3.msra.mxu1 %v150_v2  ;;  %326 = vmatpush3.msra.mxu0 %v52_v7  ;;  %v143_v16 = vld [vmem:[%s567_s4 + $0x30] sm:$0xff]  ;;  %v142_v18 = vld [vmem:[%s567_s4 + $0x28] sm:$0xff]  ;;  %v141_v20 = vld [vmem:[%s567_s4 + $0x20] sm:$0xff] }
   0x8   :  { %364 = vmatprep.subr.mxu1 %v149_v3  ;;  %327 = vmatprep.subr.mxu0 %v51_v9  ;;  %v45_v21 = vld [vmem:[%s569_s2 + $0x38] sm:$0xff]  ;;  %v44_v23 = vld [vmem:[%s569_s2 + $0x30] sm:$0xff]  ;;  %v43_v25 = vld [vmem:[%s569_s2 + $0x28] sm:$0xff] }
   0x9   :  { %365 = vmatpush3.msra.mxu1 %v149_v3  ;;  %328 = vmatpush3.msra.mxu0 %v51_v9  ;;  %v140_v22 = vld [vmem:[%s567_s4 + $0x18] sm:$0xff]  ;;  %v139_v24 = vld [vmem:[%s567_s4 + $0x10] sm:$0xff]  ;;  %v138_v26 = vld [vmem:[%s567_s4 + $0x8] sm:$0xff] }
   0xa   :  { %366 = vmatprep.subr.mxu1 %v148_v6  ;;  %329 = vmatprep.subr.mxu0 %v50_v11  ;;  %v42_v27 = vld [vmem:[%s569_s2 + $0x20] sm:$0xff]  ;;  %v41_v29 = vld [vmem:[%s569_s2 + $0x18] sm:$0xff]  ;;  %v136_v30 = vld [vmem:[%s568_s1 + $0x8] sm:$0xff] }
   0xb   :  { %367 = vmatpush3.msra.mxu1 %v148_v6  ;;  %330 = vmatpush3.msra.mxu0 %v50_v11  ;;  %v137_v28 = vld [vmem:[%s567_s4] sm:$0xff]  ;;  %v40_v31 = vld [vmem:[%s569_s2 + $0x10] sm:$0xff]  ;;  %v39_v33 = vld [vmem:[%s569_s2 + $0x8] sm:$0xff] }
   0xc   :  { %368 = vmatprep.subr.mxu1 %v147_v8  ;;  %331 = vmatprep.subr.mxu0 %v49_v13  ;;  %v36_v32 = vld [vmem:[%s570_s0] sm:$0xff]  ;;  %v37_v35 = vld [vmem:[%s570_s0 + $0x8] sm:$0xff] }
   0xd   :  { %369 = vmatpush3.msra.mxu1 %v147_v8  ;;  %332 = vmatpush3.msra.mxu0 %v49_v13  ;;  %v38_v34 = vld [vmem:[%s569_s2] sm:$0xff]  ;;  %v274_v54 = vld [vmem:[%s573_s6 + $0x8] sm:$0xff] }
   0xe   :  { %370 = vmatprep.subr.mxu1 %v146_v10  ;;  %333 = vmatprep.subr.mxu0 %v48_v15  ;;  %v284_v36 = vld [vmem:[%s571_s5] ss:$0 sm:$0xff] }
   0xf   :  { %371 = vmatpush3.msra.mxu1 %v146_v10  ;;  %334 = vmatpush3.msra.mxu0 %v48_v15  ;;  %v283_v48 = vld [vmem:[%s572_s3] ss:$0 sm:$0xff] }
  0x10   :  { %372 = vmatprep.subr.mxu1 %v145_v12  ;;  %335 = vmatprep.subr.mxu0 %v47_v17  ;;  %v273_v58 = vld [vmem:[%s573_s6] sm:$0xff] }
  0x11   :  { %373 = vmatpush3.msra.mxu1 %v145_v12  ;;  %336 = vmatpush3.msra.mxu0 %v47_v17 }
  0x12   :  { %374 = vmatprep.subr.mxu1 %v144_v14  ;;  %337 = vmatprep.subr.mxu0 %v46_v19 }
  0x13   :  { %375 = vmatpush3.msra.mxu1 %v144_v14  ;;  %338 = vmatpush3.msra.mxu0 %v46_v19 }
  0x14   :  { %376 = vmatprep.subr.mxu1 %v143_v16  ;;  %339 = vmatprep.subr.mxu0 %v45_v21 }
  0x15   :  { %377 = vmatpush3.msra.mxu1 %v143_v16  ;;  %340 = vmatpush3.msra.mxu0 %v45_v21 }
  0x16   :  { %378 = vmatprep.subr.mxu1 %v142_v18  ;;  %341 = vmatprep.subr.mxu0 %v44_v23 }
  0x17   :  { %379 = vmatpush3.msra.mxu1 %v142_v18  ;;  %342 = vmatpush3.msra.mxu0 %v44_v23 }
  0x18   :  { %380 = vmatprep.subr.mxu1 %v141_v20  ;;  %343 = vmatprep.subr.mxu0 %v43_v25 }
  0x19   :  { %381 = vmatpush3.msra.mxu1 %v141_v20  ;;  %344 = vmatpush3.msra.mxu0 %v43_v25 }
  0x1a   :  { %382 = vmatprep.subr.mxu1 %v140_v22  ;;  %345 = vmatprep.subr.mxu0 %v42_v27 }
  0x1b   :  { %383 = vmatpush3.msra.mxu1 %v140_v22  ;;  %346 = vmatpush3.msra.mxu0 %v42_v27 }
  0x1c   :  { %384 = vmatprep.subr.mxu1 %v139_v24  ;;  %347 = vmatprep.subr.mxu0 %v41_v29 }
  0x1d   :  { %385 = vmatpush3.msra.mxu1 %v139_v24  ;;  %348 = vmatpush3.msra.mxu0 %v41_v29 }
  0x1e   :  { %386 = vmatprep.subr.mxu1 %v138_v26  ;;  %349 = vmatprep.subr.mxu0 %v40_v31 }
  0x1f   :  { %387 = vmatpush3.msra.mxu1 %v138_v26  ;;  %350 = vmatpush3.msra.mxu0 %v40_v31 }
  0x20   :  { %388 = vmatprep.subr.mxu1 %v137_v28  ;;  %355 = vmatprep.mubr.f32.mxu0 %v36_v32 }
  0x21   :  { %389 = vmatpush3.msra.mxu1 %v137_v28  ;;  %351 = vmatprep.subr.mxu0 %v39_v33 }
  0x22   :  { %391 = vmatmul.mubr.f32.vlgmr.msra.gmra.mxu1 %v136_v30  ;;  %352 = vmatpush3.msra.mxu0 %v39_v33 }
  0x23   :  { %353 = vmatprep.subr.mxu0 %v38_v34 }
  0x24   :  { %354 = vmatpush3.msra.mxu0 %v38_v34 }
  0x25   :  { %356 = vmatmul.mubr.f32.vlgmr.msra.gmra.mxu0 %v37_v35 }
  0xe2   :  { %v392_v37 = vpop.f32.mrf.mxu1 }
  0xe3   :  { %v256_v38 = vadd.f32 %v392_v37, %v284_v36 }
  0xe4   :  { %v219_v39 = vpop.f32.mrf.mxu1 }
  0xe5   :  { %v286_v40 = vmul.f32 -1.442695, %v256_v38  ;;  %v255_v41 = vadd.f32 %v284_v36, %v219_v39  ;;  %v357_v47 = vpop.f32.mrf.mxu0 }
  0xe6   :  { %v245_v49 = vadd.f32 %v357_v47, %v283_v48 }
  0xe7   :  { %393 = vpow2.f32 %v286_v40  ;;  %v285_v42 = vmul.f32 -1.442695, %v255_v41  ;;  %v120_v51 = vpop.f32.mrf.mxu0 }
  0xe8   :  { %v244_v57 = vadd.f32 %v283_v48, %v120_v51 }
  0xe9   :  { %395 = vpow2.f32 %v285_v42 }
  0xf4   :  { %v394_v43 = vpop.eup %393 }
  0xf5   :  { %v264_v44 = vadd.f32 1.0, %v394_v43 }
  0xf6   :  { %v396_v45 = vpop.eup %395 }
  0xf7   :  { %397 = vrcp.f32 %v264_v44  ;;  %v263_v46 = vadd.f32 1.0, %v396_v45 }
  0xf9   :  { %399 = vrcp.f32 %v263_v46 }
 0x104   :  { %v398_v50 = vpop.eup %397 }
 0x105   :  { %v270_v52 = vmul.f32 %v398_v50, %v256_v38 }
 0x106   :  { %v400_v53 = vpop.eup %399 }
 0x107   :  { %v269_v55 = vmul.f32 %v400_v53, %v255_v41  ;;  %v272_v56 = vmul.f32 %v270_v52, %v245_v49 }
 0x109   :  { %v276_v59 = vadd.f32 %v274_v54, %v272_v56  ;;  %v271_v60 = vmul.f32 %v269_v55, %v244_v57 }
 0x10b   :  { %278 = vst [vmem:[%s574_s7 + $0x8] sm:$0xff] %v276_v59  ;;  %v275_v61 = vadd.f32 %v273_v58, %v271_v60 }
 0x10d   :  { %277 = vst [vmem:[%s574_s7] sm:$0xff] %v275_v61 }

// kernel: sconv_block_forward.12
= control target key start
LH: loop header
LB: loop body
LE: loop exit
PB: predicated region body
PF: predicated region fallthrough
CT: control target
= control target key end

     0   :  { %v380_v3 = vmov 0.0   ;;  %s631_s3 = inlined_call_operand.vmem [shape: f32[128,256], index: 3, kind: input, shape index: {}]   ;;  %s632_s1 = inlined_call_operand.vmem [shape: f32[128,256], index: 1, kind: input, shape index: {}]   ;;  %s633_s0 = inlined_call_operand.vmem [shape: f32[16,128], index: 0, kind: input, shape index: {}]   ;;  %s634_s4 = inlined_call_operand.vmem [shape: f32[1,256], index: 4, kind: input, shape index: {}]   ;;  %s635_s2 = inlined_call_operand.vmem [shape: f32[1,256], index: 2, kind: input, shape index: {}]   ;;  %s636_s5 = inlined_call_operand.vmem [shape: f32[16,256], index: 5, kind: output, shape index: {}]  }
   0x1   :  { %v190_v0 = vld [vmem:[%s631_s3 + $0xf8] sm:$0xff]  ;;  %v189_v1 = vld [vmem:[%s631_s3 + $0xf0] sm:$0xff]  ;;  %v188_v2 = vld [vmem:[%s631_s3 + $0xe8] sm:$0xff]  ;;  %255 = vmatprep.mubr.f32.mxu1 %v380_v3  ;;  %134 = vmatprep.mubr.f32.mxu0 %v380_v3 }
   0x2   :  { %191 = vmatprep.subr.mxu1 %v190_v0  ;;  %v187_v4 = vld [vmem:[%s631_s3 + $0xe0] sm:$0xff]  ;;  %v186_v5 = vld [vmem:[%s631_s3 + $0xd8] sm:$0xff]  ;;  %v185_v6 = vld [vmem:[%s631_s3 + $0xd0] sm:$0xff] }
   0x3   :  { %192 = vmatpush1.msra.mxu1 %v189_v1  ;;  %v184_v7 = vld [vmem:[%s631_s3 + $0xc8] sm:$0xff]  ;;  %v183_v8 = vld [vmem:[%s631_s3 + $0xc0] sm:$0xff]  ;;  %v182_v9 = vld [vmem:[%s631_s3 + $0xb8] sm:$0xff] }
   0x4   :  { %193 = vmatprep.subr.mxu1 %v188_v2  ;;  %v181_v10 = vld [vmem:[%s631_s3 + $0xb0] sm:$0xff]  ;;  %v180_v11 = vld [vmem:[%s631_s3 + $0xa8] sm:$0xff]  ;;  %v179_v12 = vld [vmem:[%s631_s3 + $0xa0] sm:$0xff] }
   0x5   :  { %194 = vmatpush1.msra.mxu1 %v187_v4  ;;  %v178_v13 = vld [vmem:[%s631_s3 + $0x98] sm:$0xff]  ;;  %v177_v15 = vld [vmem:[%s631_s3 + $0x90] sm:$0xff]  ;;  %v67_v17 = vld [vmem:[%s632_s1 + $0xe8] sm:$0xff]  ;;  %v285_v4 = vlaneseq }
   0x6   :  { %195 = vmatprep.subr.mxu1 %v186_v5  ;;  %v69_v14 = vld [vmem:[%s632_s1 + $0xf8] sm:$0xff]  ;;  %v68_v16 = vld [vmem:[%s632_s1 + $0xf0] sm:$0xff]  ;;  %v176_v18 = vld [vmem:[%s631_s3 + $0x88] sm:$0xff] }
   0x7   :  { %196 = vmatpush1.msra.mxu1 %v185_v6  ;;  %70 = vmatprep.subr.mxu0 %v69_v14  ;;  %v66_v19 = vld [vmem:[%s632_s1 + $0xe0] sm:$0xff]  ;;  %v65_v20 = vld [vmem:[%s632_s1 + $0xd8] sm:$0xff]  ;;  %v64_v22 = vld [vmem:[%s632_s1 + $0xd0] sm:$0xff]  ;;  %v286_v5 = vshrl.u32 %v285_v4, 7 }
   0x8   :  { %197 = vmatprep.subr.mxu1 %v184_v7  ;;  %71 = vmatpush1.msra.mxu0 %v68_v16  ;;  %v175_v21 = vld [vmem:[%s631_s3 + $0x80] sm:$0xff]  ;;  %v174_v23 = vld [vmem:[%s631_s3 + $0x78] sm:$0xff]  ;;  %v63_v24 = vld [vmem:[%s632_s1 + $0xc8] sm:$0xff] }
   0x9   :  { %198 = vmatpush1.msra.mxu1 %v183_v8  ;;  %72 = vmatprep.subr.mxu0 %v67_v17  ;;  %v173_v25 = vld [vmem:[%s631_s3 + $0x70] sm:$0xff]  ;;  %v62_v26 = vld [vmem:[%s632_s1 + $0xc0] sm:$0xff]  ;;  %v172_v27 = vld [vmem:[%s631_s3 + $0x68] sm:$0xff]  ;;  %v287_v6 = vsub.s32 0, %v286_v5  ;;  %v291_v8 = vsub.s32 1, %v286_v5 }
   0xa   :  { %199 = vmatprep.subr.mxu1 %v182_v9  ;;  %73 = vmatpush1.msra.mxu0 %v66_v19  ;;  %v61_v28 = vld [vmem:[%s632_s1 + $0xb8] sm:$0xff]  ;;  %v171_v29 = vld [vmem:[%s631_s3 + $0x60] sm:$0xff]  ;;  %v60_v30 = vld [vmem:[%s632_s1 + $0xb0] sm:$0xff] }
   0xb   :  { %200 = vmatpush1.msra.mxu1 %v181_v10  ;;  %74 = vmatprep.subr.mxu0 %v65_v20  ;;  %v170_v31 = vld [vmem:[%s631_s3 + $0x58] sm:$0xff]  ;;  %v59_v32 = vld [vmem:[%s632_s1 + $0xa8] sm:$0xff]  ;;  %v169_v33 = vld [vmem:[%s631_s3 + $0x50] sm:$0xff] }
   0xc   :  { %201 = vmatprep.subr.mxu1 %v180_v11  ;;  %75 = vmatpush1.msra.mxu0 %v64_v22  ;;  %v58_v34 = vld [vmem:[%s632_s1 + $0xa0] sm:$0xff]  ;;  %v168_v35 = vld [vmem:[%s631_s3 + $0x48] sm:$0xff]  ;;  %v57_v36 = vld [vmem:[%s632_s1 + $0x98] sm:$0xff] }
   0xd   :  { %202 = vmatpush1.msra.mxu1 %v179_v12  ;;  %76 = vmatprep.subr.mxu0 %v63_v24  ;;  %v167_v37 = vld [vmem:[%s631_s3 + $0x40] sm:$0xff]  ;;  %v56_v38 = vld [vmem:[%s632_s1 + $0x90] sm:$0xff]  ;;  %v166_v39 = vld [vmem:[%s631_s3 + $0x38] sm:$0xff] }
   0xe   :  { %203 = vmatprep.subr.mxu1 %v178_v13  ;;  %77 = vmatpush1.msra.mxu0 %v62_v26  ;;  %v55_v40 = vld [vmem:[%s632_s1 + $0x88] sm:$0xff]  ;;  %v165_v41 = vld [vmem:[%s631_s3 + $0x30] sm:$0xff]  ;;  %v54_v42 = vld [vmem:[%s632_s1 + $0x80] sm:$0xff] }
   0xf   :  { %204 = vmatpush1.msra.mxu1 %v177_v15  ;;  %78 = vmatprep.subr.mxu0 %v61_v28  ;;  %v164_v43 = vld [vmem:[%s631_s3 + $0x28] sm:$0xff]  ;;  %v53_v44 = vld [vmem:[%s632_s1 + $0x78] sm:$0xff]  ;;  %v163_v45 = vld [vmem:[%s631_s3 + $0x20] sm:$0xff] }
  0x10   :  { %205 = vmatprep.subr.mxu1 %v176_v18  ;;  %79 = vmatpush1.msra.mxu0 %v60_v30  ;;  %v52_v46 = vld [vmem:[%s632_s1 + $0x70] sm:$0xff]  ;;  %v162_v47 = vld [vmem:[%s631_s3 + $0x18] sm:$0xff]  ;;  %v51_v48 = vld [vmem:[%s632_s1 + $0x68] sm:$0xff] }
  0x11   :  { %206 = vmatpush1.msra.mxu1 %v175_v21  ;;  %80 = vmatprep.subr.mxu0 %v59_v32  ;;  %v161_v49 = vld [vmem:[%s631_s3 + $0x10] sm:$0xff]  ;;  %v50_v50 = vld [vmem:[%s632_s1 + $0x60] sm:$0xff]  ;;  %v160_v51 = vld [vmem:[%s631_s3 + $0x8] sm:$0xff] }
  0x12   :  { %207 = vmatprep.subr.mxu1 %v174_v23  ;;  %81 = vmatpush1.msra.mxu0 %v58_v34  ;;  %v49_v52 = vld [vmem:[%s632_s1 + $0x58] sm:$0xff]  ;;  %v159_v53 = vld [vmem:[%s631_s3] sm:$0xff]  ;;  %v48_v54 = vld [vmem:[%s632_s1 + $0x50] sm:$0xff] }
  0x13   :  { %208 = vmatpush1.msra.mxu1 %v173_v25  ;;  %82 = vmatprep.subr.mxu0 %v57_v36  ;;  %v32_v55 = vld [vmem:[%s633_s0] sm:$0xff]  ;;  %v47_v56 = vld [vmem:[%s632_s1 + $0x48] sm:$0xff]  ;;  %v45_v58 = vld [vmem:[%s632_s1 + $0x38] sm:$0xff] }
  0x14   :  { %209 = vmatprep.subr.mxu1 %v172_v27  ;;  %83 = vmatpush1.msra.mxu0 %v56_v38  ;;  %v46_v57 = vld [vmem:[%s632_s1 + $0x40] sm:$0xff]  ;;  %v44_v59 = vld [vmem:[%s632_s1 + $0x30] sm:$0xff]  ;;  %v33_v60 = vld [vmem:[%s633_s0 + $0x8] sm:$0xff] }
  0x15   :  { %210 = vmatpush1.msra.mxu1 %v171_v29  ;;  %84 = vmatprep.subr.mxu0 %v55_v40  ;;  %v43_v61 = vld [vmem:[%s632_s1 + $0x28] sm:$0xff]  ;;  %v42_v62 = vld [vmem:[%s632_s1 + $0x20] sm:$0xff]  ;;  %v41_v63 = vld [vmem:[%s632_s1 + $0x18] sm:$0xff] }
  0x16   :  { %211 = vmatprep.subr.mxu1 %v170_v31  ;;  %85 = vmatpush1.msra.mxu0 %v54_v42  ;;  %v40_v0 = vld [vmem:[%s632_s1 + $0x10] sm:$0xff]  ;;  %v39_v1 = vld [vmem:[%s632_s1 + $0x8] sm:$0xff]  ;;  %v38_v2 = vld [vmem:[%s632_s1] sm:$0xff] }
  0x17   :  { %212 = vmatpush1.msra.mxu1 %v169_v33  ;;  %86 = vmatprep.subr.mxu0 %v53_v44  ;;  %v303_v7 = vld [vmem:[%s634_s4] sm:$0x3] }
  0x18   :  { %213 = vmatprep.subr.mxu1 %v168_v35  ;;  %87 = vmatpush1.msra.mxu0 %v52_v46  ;;  %v308_v9 = vrot.slane %v303_v7, %v287_v6  ;;  %v312_v10 = vrot.slane %v303_v7, %v291_v8  ;;  %v283_v31 = vld [vmem:[%s635_s2] sm:$0x3] }
  0x19   :  { %214 = vmatpush1.msra.mxu1 %v167_v37  ;;  %88 = vmatprep.subr.mxu0 %v51_v48  ;;  %v288_v32 = vrot.slane %v283_v31, %v287_v6  ;;  %v292_v35 = vrot.slane %v283_v31, %v291_v8 }
  0x1a   :  { %215 = vmatprep.subr.mxu1 %v166_v39  ;;  %89 = vmatpush1.msra.mxu0 %v50_v50 }
  0x1b   :  { %216 = vmatpush1.msra.mxu1 %v165_v41  ;;  %90 = vmatprep.subr.mxu0 %v49_v52 }
  0x1c   :  { %217 = vmatprep.subr.mxu1 %v164_v43  ;;  %91 = vmatpush1.msra.mxu0 %v48_v54 }
  0x1d   :  { %218 = vmatpush1.msra.mxu1 %v163_v45  ;;  %92 = vmatprep.subr.mxu0 %v47_v56 }
  0x1e   :  { %219 = vmatprep.subr.mxu1 %v162_v47  ;;  %93 = vmatpush1.msra.mxu0 %v46_v57 }
  0x1f   :  { %220 = vmatpush1.msra.mxu1 %v161_v49  ;;  %94 = vmatprep.subr.mxu0 %v45_v58 }
  0x20   :  { %221 = vmatprep.subr.mxu1 %v160_v51  ;;  %95 = vmatpush1.msra.mxu0 %v44_v59 }
  0x21   :  { %222 = vmatpush1.msra.mxu1 %v159_v53  ;;  %96 = vmatprep.subr.mxu0 %v43_v61 }
  0x22   :  { %256 = vmatmul.mubr.f32.vlgmr.msra.gmra.mxu1 %v32_v55  ;;  %97 = vmatpush1.msra.mxu0 %v42_v62 }
  0x23   :  { %261 = vmatprep.mubr.f32.mxu1 %v380_v3  ;;  %98 = vmatprep.subr.mxu0 %v41_v63 }
  0x24   :  { %99 = vmatpush1.msra.mxu0 %v40_v0 }
  0x25   :  { %100 = vmatprep.subr.mxu0 %v39_v1 }
  0x26   :  { %262 = vmatmul.mubr.f32.gmra.mxu1 %v33_v60  ;;  %101 = vmatpush1.msra.mxu0 %v38_v2 }
  0x27   :  { %135 = vmatmul.mubr.f32.vlgmr.msra.gmra.mxu0 %v32_v55 }
  0x28   :  { %140 = vmatprep.mubr.f32.mxu0 %v380_v3 }
  0x2b   :  { %141 = vmatmul.mubr.f32.gmra.mxu0 %v33_v60 }
  0xe2   :  { %v257_v11 = vpop.f32.mrf.mxu1 }
  0xe3   :  { %v315_v12 = vadd.f32 %v308_v9, %v257_v11 }
  0xe4   :  { %v259_v13 = vpop.f32.mrf.mxu1 }
  0xe5   :  { %v359_v14 = vmul.f32 -1.442695, %v315_v12  ;;  %v316_v15 = vadd.f32 %v312_v10, %v259_v13 }
  0xe6   :  { %v263_v16 = vpop.f32.mrf.mxu1 }
  0xe7   :  { %364 = vpow2.f32 %v359_v14  ;;  %v360_v17 = vmul.f32 -1.442695, %v316_v15  ;;  %v317_v3 = vadd.f32 %v308_v9, %v263_v16  ;;  %v136_v30 = vpop.f32.mrf.mxu0 }
  0xe8   :  { %v265_v18 = vpop.f32.mrf.mxu1  ;;  %v295_v34 = vadd.f32 %v288_v32, %v136_v30 }
  0xe9   :  { %366 = vpow2.f32 %v360_v17  ;;  %v361_v19 = vmul.f32 -1.442695, %v317_v3  ;;  %v318_v20 = vadd.f32 %v312_v10, %v265_v18  ;;  %v138_v33 = vpop.f32.mrf.mxu0 }
  0xea   :  { %v296_v42 = vadd.f32 %v292_v35, %v138_v33 }
  0xeb   :  { %368 = vpow2.f32 %v361_v19  ;;  %v362_v21 = vmul.f32 -1.442695, %v318_v20  ;;  %v142_v37 = vpop.f32.mrf.mxu0 }
  0xec   :  { %v297_v43 = vadd.f32 %v288_v32, %v142_v37 }
  0xed   :  { %370 = vpow2.f32 %v362_v21  ;;  %v144_v45 = vpop.f32.mrf.mxu0 }
  0xee   :  { %v298_v51 = vadd.f32 %v292_v35, %v144_v45 }
  0xf4   :  { %v365_v22 = vpop.eup %364 }
  0xf5   :  { %v331_v23 = vadd.f32 1.0, %v365_v22 }
  0xf6   :  { %v367_v24 = vpop.eup %366 }
  0xf7   :  { %372 = vrcp.f32 %v331_v23  ;;  %v332_v25 = vadd.f32 1.0, %v367_v24 }
  0xf8   :  { %v369_v26 = vpop.eup %368 }
  0xf9   :  { %374 = vrcp.f32 %v332_v25  ;;  %v333_v27 = vadd.f32 1.0, %v369_v26 }
  0xfa   :  { %v371_v28 = vpop.eup %370 }
  0xfb   :  { %376 = vrcp.f32 %v333_v27  ;;  %v334_v29 = vadd.f32 1.0, %v371_v28 }
  0xfd   :  { %378 = vrcp.f32 %v334_v29 }
 0x104   :  { %v373_v36 = vpop.eup %372 }
 0x105   :  { %v343_v38 = vmul.f32 %v373_v36, %v315_v12 }
 0x106   :  { %v375_v39 = vpop.eup %374 }
 0x107   :  { %v344_v40 = vmul.f32 %v375_v39, %v316_v15  ;;  %v347_v41 = vmul.f32 %v343_v38, %v295_v34 }
 0x108   :  { %v377_v44 = vpop.eup %376 }
 0x109   :  { %v345_v46 = vmul.f32 %v377_v44, %v317_v3  ;;  %351 = vst [vmem:[%s636_s5] sm:$0xff] %v347_v41  ;;  %v348_v47 = vmul.f32 %v344_v40, %v296_v42 }
 0x10a   :  { %v379_v48 = vpop.eup %378 }
 0x10b   :  { %v346_v49 = vmul.f32 %v379_v48, %v318_v20  ;;  %352 = vst [vmem:[%s636_s5 + $0x8] sm:$0xff] %v348_v47  ;;  %v349_v50 = vmul.f32 %v345_v46, %v297_v43 }
 0x10d   :  { %353 = vst [vmem:[%s636_s5 + $0x10] sm:$0xff] %v349_v50  ;;  %v350_v52 = vmul.f32 %v346_v49, %v298_v51 }
 0x10f   :  { %354 = vst [vmem:[%s636_s5 + $0x18] sm:$0xff] %v350_v52 }

</bundles_post_ra>
